<compile_context>
chip_gen: v7x
topology: tpu7x:2x2x1
jax: 0.10.0
libtpu: 0.0.40
codegen_flags: <defaults>
</compile_context>

<pallas_src>
import functools

import jax
import jax.numpy as jnp
from jax import lax
from jax.experimental import pallas as pl
from jax.experimental.pallas import tpu as pltpu


_INV_SQRT2 = 0.7071067811865476


def _erf_f32(x):
    # Abramowitz & Stegun 7.1.26 rational approximation, |err| <= 1.5e-7
    # (f32-exact), built only from exp / mul / add / abs / select so it is
    # guaranteed to lower in Mosaic.
    a1, a2, a3, a4, a5 = (0.254829592, -0.284496736, 1.421413741,
                          -1.453152027, 1.061405429)
    p = 0.3275911
    sgn = jnp.where(x >= 0.0, 1.0, -1.0)
    ax = jnp.abs(x)
    t = 1.0 / (1.0 + p * ax)
    poly = ((((a5 * t + a4) * t + a3) * t + a2) * t + a1) * t
    return sgn * (1.0 - poly * jnp.exp(-ax * ax))


def _gelu_exact(x):
    # torch.nn.GELU() default (approximate='none'): 0.5 * x * (1 + erf(x/sqrt(2)))
    return 0.5 * x * (1.0 + _erf_f32(x * _INV_SQRT2))


def _mlp_projection_kernel(x_ref, w1_ref, b1_ref, w2_ref, b2_ref,
                           gamma_ref, beta_ref, o_ref, acc_ref, *, eps):
    # x_ref:      (bm, Din)   resident across the hidden (k) axis
    # w1_ref:     (Din, tk)   k-th column tile of W1^T
    # b1_ref:     (1, tk)     k-th tile of b1
    # w2_ref:     (tk, Dco)   k-th row tile of W2^T
    # b2_ref:     (1, Dco)
    # gamma/beta: (1, Dco)
    # o_ref:      (bm, Dco)
    # acc_ref:    (bm, Dco)   f32 VMEM accumulator (scratch)
    k = pl.program_id(1)

    @pl.when(k == 0)
    def _init():
        acc_ref[...] = jnp.zeros_like(acc_ref)

    mxu_dtype = w1_ref.dtype                     # f32 or bf16 weight streaming
    x = x_ref[...].astype(mxu_dtype)

    # First Linear (this hidden tile) + exact GELU, computed in f32.
    h = jnp.dot(x, w1_ref[...], preferred_element_type=jnp.float32)
    h = _gelu_exact(h + b1_ref[...])

    # Second Linear: accumulate this hidden tile's contribution.
    acc_ref[...] += jnp.dot(h.astype(mxu_dtype), w2_ref[...],
                            preferred_element_type=jnp.float32)

    @pl.when(k == pl.num_programs(1) - 1)
    def _finalize():
        y = acc_ref[...] + b2_ref[...]
        # Fused one-pass LayerNorm: sum and sum-of-squares in a single sweep.
        inv_n = 1.0 / y.shape[-1]
        s1 = jnp.sum(y, axis=-1, keepdims=True)
        s2 = jnp.sum(y * y, axis=-1, keepdims=True)
        mean = s1 * inv_n
        var = s2 * inv_n - mean * mean
        inv = lax.rsqrt(var + eps)
        o_ref[...] = ((y - mean) * inv * gamma_ref[...]
                      + beta_ref[...]).astype(o_ref.dtype)


def _pick_hidden_tile(d_h):
    for t in (256, 128, 512, 1024):
        if d_h % t == 0:
            return t
    return d_h          # ragged hidden dim: single full block (still legal)


def _pick_row_tile(rows):
    for t in (256, 128, 64, 32, 16, 8):
        if rows % t == 0:
            return t
    return rows         # small / ragged batch: single full-row block


def prepare_params(w1, b1, w2, b2, gamma, beta, param_dtype=jnp.float32):
    """One-time, load-time parameter prep (NOT part of the per-call forward):
    pre-transpose the Linear weights to (in, out) layout and lift 1-D vectors to
    (1, N) lane-major rows.  Optionally downcast the weight matrices (the
    HBM-dominant tensors) to bf16 for streaming; biases / LN params stay f32."""
    return {
        "w1_t": jnp.asarray(w1, jnp.float32).T.astype(param_dtype),
        "b1": jnp.asarray(b1, jnp.float32).reshape(1, -1),
        "w2_t": jnp.asarray(w2, jnp.float32).T.astype(param_dtype),
        "b2": jnp.asarray(b2, jnp.float32).reshape(1, -1),
        "gamma": jnp.asarray(gamma, jnp.float32).reshape(1, -1),
        "beta": jnp.asarray(beta, jnp.float32).reshape(1, -1),
    }


@functools.partial(jax.jit, static_argnames=("eps",))
def mlp_projection_forward(image_embeds, params, eps=1e-5):
    """image_embeds: (..., clip_embeddings_dim) -> (..., cross_attention_dim)."""
    w1_t, b1 = params["w1_t"], params["b1"]
    w2_t, b2 = params["w2_t"], params["b2"]
    gamma, beta = params["gamma"], params["beta"]

    *lead, d_in = image_embeds.shape
    d_h = w1_t.shape[1]
    d_co = w2_t.shape[1]

    x2 = image_embeds.reshape(-1, d_in).astype(jnp.float32)
    rows = x2.shape[0]

    bm = _pick_row_tile(rows)
    tk = _pick_hidden_tile(d_h)
    gm, gk = rows // bm, d_h // tk

    kernel = functools.partial(_mlp_projection_kernel, eps=eps)

    w_item = jnp.dtype(w1_t.dtype).itemsize
    # Real working set: double-buffered weight tiles (dominant), x / out blocks,
    # f32 accumulator, small param rows.  Keep well under v7x's 64 MiB VMEM.
    vmem_bytes = (2 * (d_in * tk + tk * d_co) * w_item
                  + 2 * bm * d_in * 4
                  + 3 * bm * d_co * 4
                  + 2 * (tk + 3 * d_co) * 4)
    vmem_limit = int(min(max(2 * vmem_bytes, 8 << 20), 64 << 20))

    cost = pl.CostEstimate(
        flops=2 * rows * d_in * d_h + 2 * rows * d_h * d_co,
        transcendentals=rows * d_h + rows,        # GELU exp + LayerNorm rsqrt
        bytes_accessed=int(x2.size * 4 + w1_t.size * w_item + w2_t.size * w_item
                           + (d_h + 3 * d_co) * 4 + rows * d_co * 4),
    )

    out = pl.pallas_call(
        kernel,
        out_shape=jax.ShapeDtypeStruct((rows, d_co), jnp.float32),
        grid_spec=pltpu.PrefetchScalarGridSpec(
            num_scalar_prefetch=0,
            grid=(gm, gk),
            in_specs=[
                pl.BlockSpec((bm, d_in), lambda i, k: (i, 0)),   # x (resident over k)
                pl.BlockSpec((d_in, tk), lambda i, k: (0, k)),   # W1^T column tile
                pl.BlockSpec((1, tk), lambda i, k: (0, k)),      # b1 tile
                pl.BlockSpec((tk, d_co), lambda i, k: (k, 0)),   # W2^T row tile
                pl.BlockSpec((1, d_co), lambda i, k: (0, 0)),    # b2
                pl.BlockSpec((1, d_co), lambda i, k: (0, 0)),    # gamma
                pl.BlockSpec((1, d_co), lambda i, k: (0, 0)),    # beta
            ],
            out_specs=pl.BlockSpec((bm, d_co), lambda i, k: (i, 0)),
            scratch_shapes=[pltpu.VMEM((bm, d_co), jnp.float32)],
        ),
        compiler_params=pltpu.CompilerParams(
            dimension_semantics=("parallel", "arbitrary"),
            vmem_limit_bytes=vmem_limit,
        ),
        cost_estimate=cost,
    )(x2, w1_t, b1, w2_t, b2, gamma, beta)

    return out.reshape(*lead, d_co)


def _reference(image_embeds, w1, b1, w2, b2, gamma, beta, eps=1e-5):
    h = image_embeds @ w1.T + b1
    h = jax.nn.gelu(h, approximate=False)         # torch.nn.GELU() default
    y = h @ w2.T + b2
    mean = jnp.mean(y, axis=-1, keepdims=True)
    var = jnp.mean((y - mean) ** 2, axis=-1, keepdims=True)
    return (y - mean) * lax.rsqrt(var + eps) * gamma + beta


if __name__ == "__main__":
    # Small shapes consistent with the module (scaled down from 1024/1024);
    # a (batch, seq, clip_dim) input matches IP-adapter "plus" usage.
    batch = 2
    seq = 8
    clip_embeddings_dim = 512
    cross_attention_dim = 256

    key = jax.random.PRNGKey(0)
    kx, k1, k2, k3, k4 = jax.random.split(key, 5)

    image_embeds = jax.random.normal(
        kx, (batch, seq, clip_embeddings_dim), dtype=jnp.float32)

    bound = 1.0 / (clip_embeddings_dim ** 0.5)
    w1 = jax.random.uniform(k1, (clip_embeddings_dim, clip_embeddings_dim),
                            jnp.float32, minval=-bound, maxval=bound)
    b1 = jax.random.uniform(k2, (clip_embeddings_dim,), jnp.float32,
                            minval=-bound, maxval=bound)
    w2 = jax.random.uniform(k3, (cross_attention_dim, clip_embeddings_dim),
                            jnp.float32, minval=-bound, maxval=bound)
    b2 = jax.random.uniform(k4, (cross_attention_dim,), jnp.float32,
                            minval=-bound, maxval=bound)
    gamma = jnp.ones((cross_attention_dim,), jnp.float32)
    beta = jnp.zeros((cross_attention_dim,), jnp.float32)

    ref = _reference(image_embeds, w1, b1, w2, b2, gamma, beta)

    # f32 weights: matches the PyTorch module's numerics.
    params_f32 = prepare_params(w1, b1, w2, b2, gamma, beta, jnp.float32)
    out = jax.block_until_ready(mlp_projection_forward(image_embeds, params_f32))
    assert out.shape == (batch, seq, cross_attention_dim)
    assert jnp.allclose(out, ref, atol=2e-3, rtol=2e-3), \
        float(jnp.max(jnp.abs(out - ref)))

    # bf16 weight streaming (halves weight HBM bytes; f32 MXU accumulation).
    params_bf16 = prepare_params(w1, b1, w2, b2, gamma, beta, jnp.bfloat16)
    out_bf16 = jax.block_until_ready(
        mlp_projection_forward(image_embeds, params_bf16))
    assert jnp.allclose(out_bf16, ref, atol=5e-2, rtol=5e-2), \
        float(jnp.max(jnp.abs(out_bf16 - ref)))

    print("KERNEL_OK")
</pallas_src>

<mosaic_0001>
module attributes {stable_mosaic.version = 11 : i64} {
  func.func @_mlp_projection_kernel(%arg0: i32, %arg1: i32, %arg2: memref<16x512xf32, #tpu.memory_space<vmem>>, %arg3: memref<512x256xf32, #tpu.memory_space<vmem>>, %arg4: memref<1x256xf32, #tpu.memory_space<vmem>>, %arg5: memref<256x256xf32, #tpu.memory_space<vmem>>, %arg6: memref<1x256xf32, #tpu.memory_space<vmem>>, %arg7: memref<1x256xf32, #tpu.memory_space<vmem>>, %arg8: memref<1x256xf32, #tpu.memory_space<vmem>>, %arg9: memref<16x256xf32, #tpu.memory_space<vmem>>, %arg10: memref<16x256xf32, #tpu.memory_space<vmem>>) attributes {dimension_semantics = [#tpu.dimension_semantics<parallel>, #tpu.dimension_semantics<arbitrary>], iteration_bounds = array<i64: 1, 2>, scalar_prefetch = 0 : i64, scratch_operands = 1 : i64, tpu.core_type = #tpu.core_type<tc>, window_params = [{transform_indices = @transform_0, window_bounds = array<i64: 16, 512>}, {transform_indices = @transform_1, window_bounds = array<i64: 512, 256>}, {transform_indices = @transform_2, window_bounds = array<i64: 1, 256>}, {transform_indices = @transform_3, window_bounds = array<i64: 256, 256>}, {pipeline_mode = #tpu.pipeline_mode<synchronous>, transform_indices = @transform_4, window_bounds = array<i64: 1, 256>}, {pipeline_mode = #tpu.pipeline_mode<synchronous>, transform_indices = @transform_5, window_bounds = array<i64: 1, 256>}, {pipeline_mode = #tpu.pipeline_mode<synchronous>, transform_indices = @transform_6, window_bounds = array<i64: 1, 256>}, {transform_indices = @transform_7, window_bounds = array<i64: 16, 256>}]} {
    %c0_i32 = arith.constant 0 : i32
    %0 = arith.cmpi eq, %arg1, %c0_i32 : i32
    %1 = arith.extui %0 : i1 to i32
    %c0_i32_0 = arith.constant 0 : i32
    %2 = arith.cmpi ne, %1, %c0_i32_0 : i32
    scf.if %2 {
      %cst_30 = arith.constant 0.000000e+00 : f32
      %58 = vector.broadcast %cst_30 : f32 to vector<16x256xf32>
      %c0_31 = arith.constant 0 : index
      %c0_32 = arith.constant 0 : index
      %59 = vector.load %arg10[%c0_31, %c0_32] : memref<16x256xf32, #tpu.memory_space<vmem>>, vector<16x256xf32>
      tpu.vector_store %arg10[%c0_31, %c0_32], %58 {strides = array<i32>} : memref<16x256xf32, #tpu.memory_space<vmem>>, vector<16x256xf32>,
    } else {
    }
    %c0 = arith.constant 0 : index
    %c0_1 = arith.constant 0 : index
    %3 = vector.load %arg2[%c0, %c0_1] : memref<16x512xf32, #tpu.memory_space<vmem>>, vector<16x512xf32>
    %c0_2 = arith.constant 0 : index
    %c0_3 = arith.constant 0 : index
    %4 = vector.load %arg3[%c0_2, %c0_3] : memref<512x256xf32, #tpu.memory_space<vmem>>, vector<512x256xf32>
    %cst = arith.constant dense<0.000000e+00> : vector<16x256xf32>
    %5 = tpu.matmul %3, %4, %cst {dimension_numbers = #tpu.dot_dimension_numbers<[1], [0], [0], [1], [0, 0, 1, 1], [], []>} : vector<16x512xf32>, vector<512x256xf32>, vector<16x256xf32> -> vector<16x256xf32>
    %c0_4 = arith.constant 0 : index
    %c0_5 = arith.constant 0 : index
    %6 = vector.load %arg4[%c0_4, %c0_5] : memref<1x256xf32, #tpu.memory_space<vmem>>, vector<1x256xf32>
    %7 = vector.broadcast %6 : vector<1x256xf32> to vector<16x256xf32>
    %8 = arith.addf %5, %7 : vector<16x256xf32>
    %cst_6 = arith.constant 5.000000e-01 : f32
    %9 = vector.broadcast %cst_6 : f32 to vector<16x256xf32>
    %10 = arith.mulf %9, %8 : vector<16x256xf32>
    %cst_7 = arith.constant 0.707106769 : f32
    %11 = vector.broadcast %cst_7 : f32 to vector<16x256xf32>
    %12 = arith.mulf %8, %11 : vector<16x256xf32>
    %cst_8 = arith.constant 0.000000e+00 : f32
    %13 = vector.broadcast %cst_8 : f32 to vector<16x256xf32>
    %14 = arith.cmpf oge, %12, %13 : vector<16x256xf32>
    %cst_9 = arith.constant 1.000000e+00 : f32
    %cst_10 = arith.constant -1.000000e+00 : f32
    %15 = vector.broadcast %cst_9 : f32 to vector<16x256xf32>
    %16 = vector.broadcast %cst_10 : f32 to vector<16x256xf32>
    %17 = arith.select %14, %15, %16 : vector<16x256xi1>, vector<16x256xf32>
    %18 = math.absf %12 : vector<16x256xf32>
    %cst_11 = arith.constant 0.327591091 : f32
    %19 = vector.broadcast %cst_11 : f32 to vector<16x256xf32>
    %20 = arith.mulf %19, %18 : vector<16x256xf32>
    %cst_12 = arith.constant 1.000000e+00 : f32
    %21 = vector.broadcast %cst_12 : f32 to vector<16x256xf32>
    %22 = arith.addf %21, %20 : vector<16x256xf32>
    %cst_13 = arith.constant 1.000000e+00 : f32
    %23 = vector.broadcast %cst_13 : f32 to vector<16x256xf32>
    %24 = arith.divf %23, %22 : vector<16x256xf32>
    %cst_14 = arith.constant 1.06140542 : f32
    %25 = vector.broadcast %cst_14 : f32 to vector<16x256xf32>
    %26 = arith.mulf %25, %24 : vector<16x256xf32>
    %cst_15 = arith.constant -1.45315206 : f32
    %27 = vector.broadcast %cst_15 : f32 to vector<16x256xf32>
    %28 = arith.addf %26, %27 : vector<16x256xf32>
    %29 = arith.mulf %28, %24 : vector<16x256xf32>
    %cst_16 = arith.constant 1.42141378 : f32
    %30 = vector.broadcast %cst_16 : f32 to vector<16x256xf32>
    %31 = arith.addf %29, %30 : vector<16x256xf32>
    %32 = arith.mulf %31, %24 : vector<16x256xf32>
    %cst_17 = arith.constant -0.284496725 : f32
    %33 = vector.broadcast %cst_17 : f32 to vector<16x256xf32>
    %34 = arith.addf %32, %33 : vector<16x256xf32>
    %35 = arith.mulf %34, %24 : vector<16x256xf32>
    %cst_18 = arith.constant 0.254829586 : f32
    %36 = vector.broadcast %cst_18 : f32 to vector<16x256xf32>
    %37 = arith.addf %35, %36 : vector<16x256xf32>
    %38 = arith.mulf %37, %24 : vector<16x256xf32>
    %cst_19 = arith.constant 0.000000e+00 : f32
    %39 = vector.broadcast %cst_19 : f32 to vector<16x256xf32>
    %40 = arith.subf %39, %18 : vector<16x256xf32>
    %41 = arith.mulf %40, %18 : vector<16x256xf32>
    %42 = math.exp %41 : vector<16x256xf32>
    %43 = arith.mulf %38, %42 : vector<16x256xf32>
    %cst_20 = arith.constant 1.000000e+00 : f32
    %44 = vector.broadcast %cst_20 : f32 to vector<16x256xf32>
    %45 = arith.subf %44, %43 : vector<16x256xf32>
    %46 = arith.mulf %17, %45 : vector<16x256xf32>
    %cst_21 = arith.constant 1.000000e+00 : f32
    %47 = vector.broadcast %cst_21 : f32 to vector<16x256xf32>
    %48 = arith.addf %47, %46 : vector<16x256xf32>
    %49 = arith.mulf %10, %48 : vector<16x256xf32>
    %c0_22 = arith.constant 0 : index
    %c0_23 = arith.constant 0 : index
    %50 = vector.load %arg10[%c0_22, %c0_23] : memref<16x256xf32, #tpu.memory_space<vmem>>, vector<16x256xf32>
    %c0_24 = arith.constant 0 : index
    %c0_25 = arith.constant 0 : index
    %51 = vector.load %arg5[%c0_24, %c0_25] : memref<256x256xf32, #tpu.memory_space<vmem>>, vector<256x256xf32>
    %cst_26 = arith.constant dense<0.000000e+00> : vector<16x256xf32>
    %52 = tpu.matmul %49, %51, %cst_26 {dimension_numbers = #tpu.dot_dimension_numbers<[1], [0], [0], [1], [0, 0, 1, 1], [], []>} : vector<16x256xf32>, vector<256x256xf32>, vector<16x256xf32> -> vector<16x256xf32>
    %53 = arith.addf %50, %52 : vector<16x256xf32>
    %c0_27 = arith.constant 0 : index
    %c0_28 = arith.constant 0 : index
    %54 = vector.load %arg10[%c0_27, %c0_28] : memref<16x256xf32, #tpu.memory_space<vmem>>, vector<16x256xf32>
    tpu.vector_store %arg10[%c0_27, %c0_28], %53 {strides = array<i32>} : memref<16x256xf32, #tpu.memory_space<vmem>>, vector<16x256xf32>,
    %c1_i32 = arith.constant 1 : i32
    %55 = arith.cmpi eq, %arg1, %c1_i32 : i32
    %56 = arith.extui %55 : i1 to i32
    %c0_i32_29 = arith.constant 0 : i32
    %57 = arith.cmpi ne, %56, %c0_i32_29 : i32
    scf.if %57 {
      %c0_30 = arith.constant 0 : index
      %c0_31 = arith.constant 0 : index
      %58 = vector.load %arg10[%c0_30, %c0_31] : memref<16x256xf32, #tpu.memory_space<vmem>>, vector<16x256xf32>
      %c0_32 = arith.constant 0 : index
      %c0_33 = arith.constant 0 : index
      %59 = vector.load %arg6[%c0_32, %c0_33] : memref<1x256xf32, #tpu.memory_space<vmem>>, vector<1x256xf32>
      %60 = vector.broadcast %59 : vector<1x256xf32> to vector<16x256xf32>
      %61 = arith.addf %58, %60 : vector<16x256xf32>
      %cst_34 = arith.constant dense<0.000000e+00> : vector<16xf32>
      %62 = vector.multi_reduction <add>, %61, %cst_34 [1] : vector<16x256xf32> to vector<16xf32>
      %63 = vector.shape_cast %62 : vector<16xf32> to vector<16x1xf32>
      %64 = arith.mulf %61, %61 : vector<16x256xf32>
      %cst_35 = arith.constant dense<0.000000e+00> : vector<16xf32>
      %65 = vector.multi_reduction <add>, %64, %cst_35 [1] : vector<16x256xf32> to vector<16xf32>
      %66 = vector.shape_cast %65 : vector<16xf32> to vector<16x1xf32>
      %cst_36 = arith.constant 3.906250e-03 : f32
      %67 = vector.broadcast %cst_36 : f32 to vector<16x1xf32>
      %68 = arith.mulf %63, %67 : vector<16x1xf32>
      %cst_37 = arith.constant 3.906250e-03 : f32
      %69 = vector.broadcast %cst_37 : f32 to vector<16x1xf32>
      %70 = arith.mulf %66, %69 : vector<16x1xf32>
      %71 = arith.mulf %68, %68 : vector<16x1xf32>
      %72 = arith.subf %70, %71 : vector<16x1xf32>
      %cst_38 = arith.constant 9.99999974E-6 : f32
      %73 = vector.broadcast %cst_38 : f32 to vector<16x1xf32>
      %74 = arith.addf %72, %73 : vector<16x1xf32>
      %75 = math.rsqrt %74 : vector<16x1xf32>
      %76 = vector.broadcast %68 : vector<16x1xf32> to vector<16x256xf32>
      %77 = arith.subf %61, %76 : vector<16x256xf32>
      %78 = vector.broadcast %75 : vector<16x1xf32> to vector<16x256xf32>
      %79 = arith.mulf %77, %78 : vector<16x256xf32>
      %c0_39 = arith.constant 0 : index
      %c0_40 = arith.constant 0 : index
      %80 = vector.load %arg7[%c0_39, %c0_40] : memref<1x256xf32, #tpu.memory_space<vmem>>, vector<1x256xf32>
      %81 = vector.broadcast %80 : vector<1x256xf32> to vector<16x256xf32>
      %82 = arith.mulf %79, %81 : vector<16x256xf32>
      %c0_41 = arith.constant 0 : index
      %c0_42 = arith.constant 0 : index
      %83 = vector.load %arg8[%c0_41, %c0_42] : memref<1x256xf32, #tpu.memory_space<vmem>>, vector<1x256xf32>
      %84 = vector.broadcast %83 : vector<1x256xf32> to vector<16x256xf32>
      %85 = arith.addf %82, %84 : vector<16x256xf32>
      %c0_43 = arith.constant 0 : index
      %c0_44 = arith.constant 0 : index
      %86 = vector.load %arg9[%c0_43, %c0_44] : memref<16x256xf32, #tpu.memory_space<vmem>>, vector<16x256xf32>
      tpu.vector_store %arg9[%c0_43, %c0_44], %85 {strides = array<i32>} : memref<16x256xf32, #tpu.memory_space<vmem>>, vector<16x256xf32>,
    } else {
    }
    return
  }
  func.func @transform_0(%arg0: i32, %arg1: i32) -> (i32, i32) {
    %c0_i32 = arith.constant 0 : i32
    %c0_i32_0 = arith.constant 0 : i32
    return %arg0, %c0_i32 : i32, i32
  }
  func.func @transform_1(%arg0: i32, %arg1: i32) -> (i32, i32) {
    %c0_i32 = arith.constant 0 : i32
    %c0_i32_0 = arith.constant 0 : i32
    return %c0_i32, %arg1 : i32, i32
  }
  func.func @transform_2(%arg0: i32, %arg1: i32) -> (i32, i32) {
    %c0_i32 = arith.constant 0 : i32
    %c0_i32_0 = arith.constant 0 : i32
    return %c0_i32, %arg1 : i32, i32
  }
  func.func @transform_3(%arg0: i32, %arg1: i32) -> (i32, i32) {
    %c0_i32 = arith.constant 0 : i32
    %c0_i32_0 = arith.constant 0 : i32
    return %arg1, %c0_i32 : i32, i32
  }
  func.func @transform_4(%arg0: i32, %arg1: i32) -> (i32, i32) {
    %c0_i32 = arith.constant 0 : i32
    %c0_i32_0 = arith.constant 0 : i32
    %c0_i32_1 = arith.constant 0 : i32
    return %c0_i32, %c0_i32_0 : i32, i32
  }
  func.func @transform_5(%arg0: i32, %arg1: i32) -> (i32, i32) {
    %c0_i32 = arith.constant 0 : i32
    %c0_i32_0 = arith.constant 0 : i32
    %c0_i32_1 = arith.constant 0 : i32
    return %c0_i32, %c0_i32_0 : i32, i32
  }
  func.func @transform_6(%arg0: i32, %arg1: i32) -> (i32, i32) {
    %c0_i32 = arith.constant 0 : i32
    %c0_i32_0 = arith.constant 0 : i32
    %c0_i32_1 = arith.constant 0 : i32
    return %c0_i32, %c0_i32_0 : i32, i32
  }
  func.func @transform_7(%arg0: i32, %arg1: i32) -> (i32, i32) {
    %c0_i32 = arith.constant 0 : i32
    %c0_i32_0 = arith.constant 0 : i32
    return %arg0, %c0_i32 : i32, i32
  }
}

</mosaic_0001>

<bundles_post_ra>
// kernel: mlp_projection_forward.1
= control target key start
LH: loop header
LB: loop body
LE: loop exit
PB: predicated region body
PF: predicated region fallthrough
CT: control target
= control target key end

     0   :  { %s2222_s0 = inlined_call_operand.hbm [shape: f32[16,512], index: 0, kind: input, shape index: {}]   ;;  %s2223_s1 = inlined_call_operand.hbm [shape: f32[512,512], index: 1, kind: input, shape index: {}]   ;;  %s2224_s2 = inlined_call_operand.vmem [shape: f32[1,512], index: 2, kind: input, shape index: {}]   ;;  %s2225_s3 = inlined_call_operand.hbm [shape: f32[512,256], index: 3, kind: input, shape index: {}]   ;;  %s2226_s4 = inlined_call_operand.vmem [shape: f32[1,256], index: 4, kind: input, shape index: {}]   ;;  %s2227_s5 = inlined_call_operand.vmem [shape: f32[1,256], index: 5, kind: input, shape index: {}]   ;;  %s2228_s6 = inlined_call_operand.vmem [shape: f32[1,256], index: 6, kind: input, shape index: {}]   ;;  %s2229_s7 = inlined_call_operand.hbm [shape: f32[16,256], index: 7, kind: output, shape index: {}]  }
   0x1   :  { %2241 = sst [smem:[#allocation15_spill]] %s2223_s1 }
   0x2   :  { %12 = vsyncpa [#allocation4], 0 }
   0x3   :  { %13 = vsyncpa [#allocation7], 0 }
   0x4   :  { %15 = vsyncpa [#allocation7 + $0x1], 0 }
   0x5   :  { %16 = vsyncpa [#allocation5], 0  ;;  %s1728_s24 = smov 0   ;;  %s1730_s25 = smov 0  }
   0x6   :  { %s1732_s26 = smov 0   ;;  %s1734_s27 = smov 0  }
   0x7   :  { %s1736_s28 = smov 0   ;;  %s1738_s29 = smov 0  }
   0x8 LB: > { %2242 = sst [smem:[#allocation13_spill]] %s1670_s28  ;;  %s31_s30 = sadd.s32 1, %s1670_s28  ;;  %s1674_s29 = sphi %s1738_s29, %s22_s29   ;;  %s1670_s28 = sphi %s1736_s28, %s2260_s28   ;;  %s1666_s27 = sphi %s1734_s27, %s2259_s27   ;;  %s1662_s26 = sphi %s1732_s26, %s2263_s26   ;;  %s1658_s25 = sphi %s1730_s25, %s2262_s25   ;;  %s1654_s24 = sphi %s1728_s24, %s2261_s24  }
   0x9   : > { %s67_s8 = sadd.s32 1, %s1662_s26  ;;  %p32_p0 = scmp.ge.s32.totalorder %s31_s30, 2 }
   0xa   : > { %p74_p1 = scmp.ne.s32.totalorder %s1662_s26, %s1658_s25  ;;  %p75_p2 = scmp.eq.s32.totalorder %s1674_s29, 0 }
   0xb   : > { %s2265_s30 = smov (%p32_p0, %s31_s30), 0  ;;  %p1420_p4 = scmp.lt.s32.totalorder %s1674_s29, 2 }
   0xc   : > { %2243 = sst [smem:[#allocation14_spill]] %s2265_s30  ;;  %p76_p3 = por %p75_p2, %p74_p1 }
   0xd   : > { %s64_s9 = ssub.s32 %s1670_s28, %s2265_s30  ;;  %s271_s10 = sand.u32 1, %s1674_s29  }
   0xe   : > { %p65_p5 = scmp.eq.s32.totalorder %s64_s9, 0  ;;  %s273_s11 = sand.u32 1, %s1662_s26  }
   0xf   : > { %s1175_s13 = sshll.u32 %s273_s11, 10  ;;  %s1193_s14 = sshll.u32 %s1670_s28, 8 }
  0x10   : > { %s1771_s12 = scalar_select %p65_p5, %s1662_s26, %s67_s8  }
  0x11   : > { %s2244_s1 = sld [smem:[#allocation15_spill]]  ;;  %s275_s18 = scalar_lea.vmem [#allocation6], %s1175_s13 }
  0x12   : > { %s282_s19 = sshll.u32 %s275_s18, 4  ;;  %p1781_p6 = pnand %p1420_p4, %p76_p3  ;;  %s1785_s19 = int_to_ptr.vmem [resolvable:$true] %s282_s19 }
  0x13   : > { %s1787_s21 = scalar_lea.sflag [#allocation7], %s271_s10 }
  0x14   : > { %s2245_s20 = scalar_select %p1781_p6, 1, 0 }
  0x15   : > { %p2236_p8 = pneg %p1781_p6 }
  0x17   : > { %s1779_s17 = scalar_lea.hbm %s2244_s1, %s1193_s14  ;;  %s1507_s9 = scalar_lea.hbm %s2244_s1, 32768 }
  0x18   : > { %s1502_s22 = scalar_lea.hbm %s1779_s17, 16384  ;;  %p1508_p11 = scmp.lt.u32.totalorder %s1779_s17, %s2244_s1 }
  0x19   : > { %p1503_p7 = scmp.ne.s32.totalorder %s1779_s17, %s1502_s22  ;;  %p1509_p12 = scmp.lt.u32.totalorder %s1507_s9, %s1502_s22 }
  0x1a   : > { %p1511_p0 = scmp.lt.u32.totalorder %s1502_s22, %s1779_s17 }
  0x1b   : > { %p1505_p9 = pnand %p2236_p8, %p1503_p7  ;;  %p1510_p13 = por %p1509_p12, %p1508_p11 }
  0x1d   : > { %p1506_p10 = pneg %p1505_p9  ;;  %p1512_p1 = por %p1511_p0, %p1510_p13 }
  0x1f   : > { %p1513_p2 = pnand %p1512_p1, %p1506_p10 }
  0x21   : > { %1516 = shalt.err (!%p1513_p2)
}
  0x22   : > { %s1517_s10 = scalar_lea.vmem %s1785_s19, 16384  ;;  %s1676_s15 = smov [#allocation6]  }
  0x23   : > { %p1518_p3 = scmp.ne.s32.totalorder %s1785_s19, %s1517_s10  ;;  %s1522_s16 = sshll.u32 %s1676_s15, 4  ;;  %s1523_s16 = int_to_ptr.vmem [resolvable:$false] %s1522_s16 }
  0x24   : > { %s1524_s18 = scalar_lea.vmem %s1523_s16, 32768  ;;  %p1525_p7 = scmp.lt.s32.totalorder %s1785_s19, %s1523_s16 }
  0x25   : > { %p1520_p4 = pnand %p1518_p3, %p2236_p8  ;;  %p1526_p9 = scmp.lt.s32.totalorder %s1524_s18, %s1517_s10 }
  0x27   : > { %p1521_p5 = pneg %p1520_p4  ;;  %p1527_p11 = por %p1526_p9, %p1525_p7 }
  0x29   : > { %p1528_p12 = pnand %p1527_p11, %p1521_p5 }
  0x2b   : > { %1531 = shalt.err (!%p1528_p12)
}
  0x2c   : > { %s2232_s22 = smov 512   ;;  %s2230_s23 = smov 256  }
  0x2d   : > { %s2231_s8 = smov 16   ;;  %s1819_s9 = sadd.s32 4294967295, %s1674_s29  }
  0x2e   : > { %1415 = dma.hbm_to_vmem [thread:$0]  (!%p1781_p6), %s1779_s17, 16384, %s1785_s19, %s1787_s21, %s2232_s22, %s2230_s23, %s2231_s8  }
  0x2f   : > { %p80_p10 = scmp.ne.s32.totalorder %s1658_s25, %s1654_s24  ;;  %p2235_p13 = scmp.eq.s32.totalorder %s1819_s9, 0 }
  0x30   : > { %p1172_p0 = scmp.ge.s32.totalorder %s1674_s29, 1  ;;  %p232_p1 = scmp.lt.s32.totalorder %s1674_s29, 3 }
  0x31   : > { %p1828_p2 = por %p2235_p13, %p80_p10  ;;  %s1680_s17 = smov [#allocation3]  }
  0x32   : > { %p1832_p3 = pnand %p1172_p0, %p232_p1  ;;  %s248_s19 = sshll.u32 %s1680_s17, 4  ;;  %s1836_s19 = int_to_ptr.vmem [resolvable:$true] %s248_s19 }
  0x33   : > { %s2246_s13 = scalar_select %p1828_p2, 1, 0 }
  0x34   : > { %s2247_s14 = scalar_select %p1832_p3, 1, 0 }
  0x35   : > { %p1408_p4 = pneg %p1832_p3  ;;  %s1178_s24 = sshll.u32 %s273_s11, 9 }
  0x36   : > { %s1195_s10 = sshll.u32 %s1670_s28, 13  ;;  %s304_s8 = scalar_lea.vmem [#allocation8], %s1178_s24 }
  0x37   : > { %p1845_p5 = pnand %p1408_p4, %p2235_p13  ;;  %s1852_s23 = scalar_lea.hbm %s2225_s3, %s1195_s10 }
  0x38   : > { %s312_s17 = sshll.u32 %s304_s8, 4  ;;  %s1532_s11 = scalar_lea.hbm %s2222_s0, 1024  ;;  %s1854_s17 = int_to_ptr.vmem [resolvable:$true] %s312_s17 }
  0x39   : > { %p1533_p7 = scmp.ne.s32.totalorder %s2222_s0, %s1532_s11  ;;  %p1534_p9 = pneg %p1845_p5 }
  0x3a   : > { %p1539_p10 = scmp.lt.u32.totalorder %s1532_s11, %s2222_s0 }
  0x3b   : > { %p1535_p11 = pnand %p1534_p9, %p1533_p7 }
  0x3d   : > { %p1536_p12 = pneg %p1535_p11 }
  0x3f   : > { %p1541_p0 = pnand %p1539_p10, %p1536_p12 }
  0x41   : > { %1544 = shalt.err (!%p1541_p0)
}
  0x42   : > { %s1545_s8 = scalar_lea.vmem %s1836_s19, 1024  ;;  %p1553_p8 = scmp.lt.s32.totalorder %s1836_s19, %s1836_s19 }
  0x43   : > { %p1546_p1 = scmp.ne.s32.totalorder %s1836_s19, %s1545_s8  ;;  %p1554_p2 = scmp.lt.s32.totalorder %s1545_s8, %s1545_s8 }
  0x45   : > { %p1548_p4 = pnand %p1546_p1, %p1534_p9  ;;  %p1555_p3 = por %p1554_p2, %p1553_p8 }
  0x47   : > { %p1549_p13 = pneg %p1548_p4 }
  0x49   : > { %p1556_p6 = pnand %p1555_p3, %p1549_p13 }
  0x4b   : > { %1559 = shalt.err (!%p1556_p6)
}
  0x4c   : > { %s1681_s1 = smov 32   ;;  %s2249_s28 = smov 512  }
  0x4d   : > { %1411 = dma.hbm_to_vmem [thread:$0]  (!%p1845_p5), %s2222_s0, 1024, %s1836_s19, [#allocation4], %s2249_s28, %s2249_s28, %s1681_s1  }
  0x4e   : > { %s1560_s24 = scalar_lea.hbm %s1852_s23, 8192  ;;  %p2250_p8 = scmp.ne.s32.totalorder %s2245_s20, 0 }
  0x4f   : > { %p1561_p7 = scmp.ne.s32.totalorder %s1852_s23, %s1560_s24  ;;  %s1565_s11 = scalar_lea.hbm %s2225_s3, 16384 }
  0x50   : > { %p2251_p13 = pneg %p2250_p8  ;;  %p1566_p3 = scmp.lt.u32.totalorder %s1852_s23, %s2225_s3 }
  0x51   : > { %p1567_p9 = scmp.lt.u32.totalorder %s1565_s11, %s1560_s24  ;;  %p1569_p12 = scmp.lt.u32.totalorder %s1560_s24, %s1852_s23 }
  0x52   : > { %p1563_p6 = pnand %p1561_p7, %p2251_p13 }
  0x53   : > { %p1568_p11 = por %p1567_p9, %p1566_p3 }
  0x54   : > { %p1564_p2 = pneg %p1563_p6 }
  0x55   : > { %p1570_p10 = por %p1569_p12, %p1568_p11 }
  0x57   : > { %p1571_p0 = pnand %p1570_p10, %p1564_p2 }
  0x59   : > { %1574 = shalt.err (!%p1571_p0)
}
  0x5a   : > { %s1575_s19 = scalar_lea.vmem %s1854_s17, 8192  ;;  %p2252_p1 = pmov %p2251_p13 }
  0x5b   : > { %p1576_p5 = scmp.ne.s32.totalorder %s1854_s17, %s1575_s19  ;;  %s1682_s8 = smov [#allocation8]  }
  0x5c   : > { %s1580_s1 = sshll.u32 %s1682_s8, 4  ;;  %s1581_s1 = int_to_ptr.vmem [resolvable:$false] %s1580_s1 }
  0x5d   : > { %p1578_p4 = pnand %p1576_p5, %p2252_p1  ;;  %s1582_s28 = scalar_lea.vmem %s1581_s1, 16384 }
  0x5e   : > { %p1583_p13 = scmp.lt.s32.totalorder %s1854_s17, %s1581_s1  ;;  %p1584_p6 = scmp.lt.s32.totalorder %s1582_s28, %s1575_s19 }
  0x5f   : > { %p1579_p7 = pneg %p1578_p4 }
  0x60   : > { %p1585_p3 = por %p1584_p6, %p1583_p13 }
  0x62   : > { %p1586_p9 = pnand %p1585_p3, %p1579_p7 }
  0x64   : > { %1589 = shalt.err (!%p1586_p9)
}
  0x65   : > { %s2253_s30 = smov 16   ;;  %s2254_s22 = smov 256  }
  0x66   : > { %1418 = dma.hbm_to_vmem [thread:$0]  (!%p2250_p8), %s1852_s23, 8192, %s1854_s17, %s1787_s21, %s2254_s22, %s2254_s22, %s2253_s30  }
  0x67   : > { %p2255_p2 = scmp.ne.s32.totalorder %s2247_s14, 0 }
  0x68   : > { %p2256_p11 = scmp.eq.s32.totalorder (!%p2255_p2), %s1819_s9, 0 }
  0x69   : > { %324 = sbr.rel (%p2255_p2) target bundleno = 948 (0x3b4), region = 48 }
  0x70   : > { %1641 = dma.done.wait (%p2256_p11), [#allocation4], 1024   ;;  %p2257_p12 = pmov %p2256_p11 }
  0x71   : > { %s330_s20 = sand.u32 1, %s1819_s9   ;;  %s332_s24 = sand.u32 1, %s1658_s25  }
  0x72   : > { %1643 = vsyncadd (%p2257_p12), [#allocation4], 4294966272  ;;  %s1184_s10 = sshll.u32 %s332_s24, 10  ;;  %s331_s15 = scalar_lea.sflag [#allocation7], %s330_s20 }
  0x73   : > { %s1914_s11 = scalar_lea.vmem [#allocation6], %s1184_s10  ;;  %p2258_p10 = scmp.ne.s32.totalorder %s2246_s13, 0 }
  0x75   : > { %1645 = dma.done.wait (%p2258_p10), %s331_s15, 24576  }
  0x76   : > { %1647 = vsyncadd (%p2258_p10), %s331_s15, 4294942720  ;;  %s1185_s21 = sshll.u32 %s332_s24, 9  ;;  %s1186_s23 = sshll.u32 %s1666_s27, 1 }
  0x77   : > { %p381_p8 = scmp.lt.s32.totalorder %s1186_s23, 3  ;;  %s1927_s18 = scalar_lea.vmem [#allocation8], %s1185_s21 }
  0x78   : > { %p1187_p0 = scmp.ne.s32.totalorder %s1666_s27, 0 }
  0x79   : > { %s2267_s23 = smov (!%p381_p8, %s1186_s23), 3  ;;  %v1683_v0 = vmov (!%p1187_p0), 0.0  }
  0x7a   : > { %s383_s16 = scalar_lea.vmem %s2224_s2, %s2267_s23  ;;  %390 = sbr.rel (%p1187_p0) target bundleno = 129 (0x81), region = 64  ;;  %391 = vst [vmem:[#allocation2] sm:$0xff] (!%p1187_p0), %v1683_v0  ;;  %392 = vst [vmem:[#allocation2 + $0x8] sm:$0xff] (!%p1187_p0), %v1683_v0 }
  0x7b   : > { %393 = vst [vmem:[#allocation2 + $0x10] sm:$0xff] (!%p1187_p0), %v1683_v0  ;;  %394 = vst [vmem:[#allocation2 + $0x18] sm:$0xff] (!%p1187_p0), %v1683_v0 }
  0x81 PF: > { %v404_v1 = vld [vmem:[%s1914_s11 + $0x8] sm:$0xff]  ;;  %v406_v2 = vld [vmem:[%s1914_s11 + $0x18] sm:$0xff]  ;;  %v403_v3 = vld [vmem:[%s1914_s11] sm:$0xff]  ;;  %p1188_p5 = scmp.ne.s32.totalorder %s1666_s27, 1 }
  0x82   : > { %v1196_v4 = vpack.c.bf16 %v406_v2, %v404_v1  ;;  %v405_v5 = vld [vmem:[%s1914_s11 + $0x10] sm:$0xff]  ;;  %v408_v6 = vld [vmem:[%s1914_s11 + $0x28] sm:$0xff]  ;;  %v410_v7 = vld [vmem:[%s1914_s11 + $0x38] sm:$0xff] }
  0x83   : > { %v1198_v8 = vpack.c.bf16 %v405_v5, %v403_v3  ;;  %v1200_v9 = vpack.c.bf16 %v410_v7, %v408_v6  ;;  %v407_v10 = vld [vmem:[%s1914_s11 + $0x20] sm:$0xff]  ;;  %v409_v11 = vld [vmem:[%s1914_s11 + $0x30] sm:$0xff]  ;;  %v412_v12 = vld [vmem:[%s1914_s11 + $0x48] sm:$0xff] }
  0x84   : > { %1197 = vmatprep.subr.bf16.mxu0 %v1196_v4  ;;  %v414_v13 = vld [vmem:[%s1914_s11 + $0x58] sm:$0xff]  ;;  %v1202_v14 = vpack.c.bf16 %v409_v11, %v407_v10  ;;  %v411_v16 = vld [vmem:[%s1914_s11 + $0x40] sm:$0xff]  ;;  %v413_v17 = vld [vmem:[%s1914_s11 + $0x50] sm:$0xff] }
  0x85   : > { %1199 = vmatpush1.bf16.msra.mxu0 %v1198_v8  ;;  %v1204_v15 = vpack.c.bf16 %v414_v13, %v412_v12  ;;  %v416_v18 = vld [vmem:[%s1914_s11 + $0x68] sm:$0xff]  ;;  %v418_v19 = vld [vmem:[%s1914_s11 + $0x78] sm:$0xff]  ;;  %v1206_v20 = vpack.c.bf16 %v413_v17, %v411_v16  ;;  %v415_v22 = vld [vmem:[%s1914_s11 + $0x60] sm:$0xff] }
  0x86   : > { %1201 = vmatprep.subr.bf16.mxu0 %v1200_v9  ;;  %v1208_v21 = vpack.c.bf16 %v418_v19, %v416_v18  ;;  %v417_v23 = vld [vmem:[%s1914_s11 + $0x70] sm:$0xff]  ;;  %v420_v24 = vld [vmem:[%s1914_s11 + $0x88] sm:$0xff]  ;;  %v422_v25 = vld [vmem:[%s1914_s11 + $0x98] sm:$0xff] }
  0x87   : > { %v1210_v26 = vpack.c.bf16 %v417_v23, %v415_v22  ;;  %v1212_v27 = vpack.c.bf16 %v422_v25, %v420_v24  ;;  %v419_v28 = vld [vmem:[%s1914_s11 + $0x80] sm:$0xff]  ;;  %v421_v29 = vld [vmem:[%s1914_s11 + $0x90] sm:$0xff]  ;;  %v424_v30 = vld [vmem:[%s1914_s11 + $0xa8] sm:$0xff] }
  0x88   : > { %v426_v31 = vld [vmem:[%s1914_s11 + $0xb8] sm:$0xff]  ;;  %v1214_v32 = vpack.c.bf16 %v421_v29, %v419_v28  ;;  %v423_v34 = vld [vmem:[%s1914_s11 + $0xa0] sm:$0xff]  ;;  %v425_v35 = vld [vmem:[%s1914_s11 + $0xb0] sm:$0xff] }
  0x89   : > { %1203 = vmatpush1.bf16.msra.mxu0 %v1202_v14  ;;  %v1216_v33 = vpack.c.bf16 %v426_v31, %v424_v30  ;;  %v428_v36 = vld [vmem:[%s1914_s11 + $0xc8] sm:$0xff]  ;;  %v430_v37 = vld [vmem:[%s1914_s11 + $0xd8] sm:$0xff]  ;;  %v1218_v38 = vpack.c.bf16 %v425_v35, %v423_v34  ;;  %v427_v40 = vld [vmem:[%s1914_s11 + $0xc0] sm:$0xff] }
  0x8a   : > { %1205 = vmatprep.subr.bf16.mxu0 %v1204_v15  ;;  %v1220_v39 = vpack.c.bf16 %v430_v37, %v428_v36  ;;  %v429_v41 = vld [vmem:[%s1914_s11 + $0xd0] sm:$0xff]  ;;  %v396_v42 = vld [vmem:[#allocation3 + $0x8] sm:$0xff]  ;;  %v434_v44 = vld [vmem:[%s1914_s11 + $0xf8] sm:$0xff] }
  0x8b   : > { %v432_v43 = vld [vmem:[%s1914_s11 + $0xe8] sm:$0xff]  ;;  %607 = vmatprep.mubr.f32.mxu0 %v396_v42  ;;  %v1222_v45 = vpack.c.bf16 %v429_v41, %v427_v40  ;;  %v431_v47 = vld [vmem:[%s1914_s11 + $0xe0] sm:$0xff]  ;;  %v433_v48 = vld [vmem:[%s1914_s11 + $0xf0] sm:$0xff] }
  0x8c   : > { %v1224_v46 = vpack.c.bf16 %v434_v44, %v432_v43  ;;  %v436_v49 = vld [vmem:[%s1914_s11 + $0x108] sm:$0xff]  ;;  %v438_v50 = vld [vmem:[%s1914_s11 + $0x118] sm:$0xff]  ;;  %v1226_v51 = vpack.c.bf16 %v433_v48, %v431_v47  ;;  %v435_v53 = vld [vmem:[%s1914_s11 + $0x100] sm:$0xff] }
  0x8d   : > { %1207 = vmatpush1.bf16.msra.mxu0 %v1206_v20  ;;  %v1228_v52 = vpack.c.bf16 %v438_v50, %v436_v49  ;;  %v437_v54 = vld [vmem:[%s1914_s11 + $0x110] sm:$0xff]  ;;  %v440_v55 = vld [vmem:[%s1914_s11 + $0x128] sm:$0xff]  ;;  %v442_v56 = vld [vmem:[%s1914_s11 + $0x138] sm:$0xff] }
  0x8e   : > { %1209 = vmatprep.subr.bf16.mxu0 %v1208_v21  ;;  %v1230_v57 = vpack.c.bf16 %v437_v54, %v435_v53  ;;  %v1232_v58 = vpack.c.bf16 %v442_v56, %v440_v55  ;;  %v439_v59 = vld [vmem:[%s1914_s11 + $0x120] sm:$0xff]  ;;  %v441_v60 = vld [vmem:[%s1914_s11 + $0x130] sm:$0xff]  ;;  %v444_v61 = vld [vmem:[%s1914_s11 + $0x148] sm:$0xff] }
  0x8f   : > { %v446_v62 = vld [vmem:[%s1914_s11 + $0x158] sm:$0xff]  ;;  %v1234_v63 = vpack.c.bf16 %v441_v60, %v439_v59  ;;  %v443_v1 = vld [vmem:[%s1914_s11 + $0x140] sm:$0xff]  ;;  %v445_v2 = vld [vmem:[%s1914_s11 + $0x150] sm:$0xff] }
  0x90   : > { %v1236_v0 = vpack.c.bf16 %v446_v62, %v444_v61  ;;  %v448_v3 = vld [vmem:[%s1914_s11 + $0x168] sm:$0xff]  ;;  %v450_v4 = vld [vmem:[%s1914_s11 + $0x178] sm:$0xff]  ;;  %v1238_v5 = vpack.c.bf16 %v445_v2, %v443_v1  ;;  %v447_v7 = vld [vmem:[%s1914_s11 + $0x160] sm:$0xff] }
  0x91   : > { %1211 = vmatpush1.bf16.msra.mxu0 %v1210_v26  ;;  %v1240_v6 = vpack.c.bf16 %v450_v4, %v448_v3  ;;  %v449_v8 = vld [vmem:[%s1914_s11 + $0x170] sm:$0xff]  ;;  %v452_v9 = vld [vmem:[%s1914_s11 + $0x188] sm:$0xff]  ;;  %v454_v10 = vld [vmem:[%s1914_s11 + $0x198] sm:$0xff] }
  0x92   : > { %1213 = vmatprep.subr.bf16.mxu0 %v1212_v27  ;;  %v1242_v11 = vpack.c.bf16 %v449_v8, %v447_v7  ;;  %v451_v12 = vld [vmem:[%s1914_s11 + $0x180] sm:$0xff]  ;;  %v453_v13 = vld [vmem:[%s1914_s11 + $0x190] sm:$0xff]  ;;  %v456_v14 = vld [vmem:[%s1914_s11 + $0x1a8] sm:$0xff]  ;;  %v1244_v15 = vpack.c.bf16 %v454_v10, %v452_v9 }
  0x93   : > { %v458_v16 = vld [vmem:[%s1914_s11 + $0x1b8] sm:$0xff]  ;;  %v810_v17 = vld [vmem:[%s1927_s18 + $0x8] sm:$0xff]  ;;  %v809_v20 = vld [vmem:[%s1927_s18] sm:$0xff]  ;;  %v1246_v27 = vpack.c.bf16 %v453_v13, %v451_v12 }
  0x94   : > { %v812_v18 = vld [vmem:[%s1927_s18 + $0x18] sm:$0xff]  ;;  %v811_v21 = vld [vmem:[%s1927_s18 + $0x10] sm:$0xff]  ;;  %v814_v22 = vld [vmem:[%s1927_s18 + $0x28] sm:$0xff]  ;;  %v1248_v31 = vpack.c.bf16 %v458_v16, %v456_v14 }
  0x95   : > { %1215 = vmatpush1.bf16.msra.mxu0 %v1214_v32  ;;  %v1324_v19 = vpack.c.bf16 %v812_v18, %v810_v17  ;;  %v1326_v23 = vpack.c.bf16 %v811_v21, %v809_v20  ;;  %v816_v24 = vld [vmem:[%s1927_s18 + $0x38] sm:$0xff]  ;;  %v813_v25 = vld [vmem:[%s1927_s18 + $0x20] sm:$0xff]  ;;  %v815_v26 = vld [vmem:[%s1927_s18 + $0x30] sm:$0xff] }
  0x96   : > { %1217 = vmatprep.subr.bf16.mxu0 %v1216_v33  ;;  %v1328_v28 = vpack.c.bf16 %v816_v24, %v814_v22  ;;  %v818_v29 = vld [vmem:[%s1927_s18 + $0x48] sm:$0xff]  ;;  %v820_v30 = vld [vmem:[%s1927_s18 + $0x58] sm:$0xff]  ;;  %v455_v32 = vld [vmem:[%s1914_s11 + $0x1a0] sm:$0xff]  ;;  %v1330_v35 = vpack.c.bf16 %v815_v26, %v813_v25 }
  0x97   : > { %1325 = vmatprep.subr.bf16.mxu1 %v1324_v19  ;;  %v457_v33 = vld [vmem:[%s1914_s11 + $0x1b0] sm:$0xff]  ;;  %v460_v34 = vld [vmem:[%s1914_s11 + $0x1c8] sm:$0xff]  ;;  %v462_v36 = vld [vmem:[%s1914_s11 + $0x1d8] sm:$0xff]  ;;  %v1332_v37 = vpack.c.bf16 %v820_v30, %v818_v29 }
  0x98   : > { %1327 = vmatpush1.bf16.msra.mxu1 %v1326_v23  ;;  %v1250_v40 = vpack.c.bf16 %v457_v33, %v455_v32  ;;  %v1252_v41 = vpack.c.bf16 %v462_v36, %v460_v34  ;;  %v459_v42 = vld [vmem:[%s1914_s11 + $0x1c0] sm:$0xff]  ;;  %v461_v43 = vld [vmem:[%s1914_s11 + $0x1d0] sm:$0xff]  ;;  %v476_v1 = vld [vmem:[%s1914_s11 + $0x248] sm:$0xff] }
  0x99   : > { %1219 = vmatpush1.bf16.msra.mxu0 %v1218_v38  ;;  %1329 = vmatprep.subr.bf16.mxu1 %v1328_v28  ;;  %v817_v38 = vld [vmem:[%s1927_s18 + $0x40] sm:$0xff]  ;;  %v1254_v47 = vpack.c.bf16 %v461_v43, %v459_v42  ;;  %v465_v50 = vld [vmem:[%s1914_s11 + $0x1f0] sm:$0xff]  ;;  %v478_v2 = vld [vmem:[%s1914_s11 + $0x258] sm:$0xff] }
  0x9a   : > { %1221 = vmatprep.subr.bf16.mxu0 %v1220_v39  ;;  %v819_v39 = vld [vmem:[%s1927_s18 + $0x50] sm:$0xff]  ;;  %v463_v49 = vld [vmem:[%s1914_s11 + $0x1e0] sm:$0xff]  ;;  %v398_v8 = vld [vmem:[#allocation3 + $0x18] sm:$0xff] }
  0x9b   : > { %v1334_v44 = vpack.c.bf16 %v819_v39, %v817_v38  ;;  %v1258_v53 = vpack.c.bf16 %v465_v50, %v463_v49  ;;  %v467_v55 = vld [vmem:[%s1914_s11 + $0x200] sm:$0xff]  ;;  %v469_v56 = vld [vmem:[%s1914_s11 + $0x210] sm:$0xff]  ;;  %v480_v9 = vld [vmem:[%s1914_s11 + $0x268] sm:$0xff] }
  0x9c   : > { %1331 = vmatpush1.bf16.msra.mxu1 %v1330_v35  ;;  %v395_v59 = vld [vmem:[#allocation3] sm:$0xff]  ;;  %v1262_v60 = vpack.c.bf16 %v469_v56, %v467_v55  ;;  %v477_v7 = vld [vmem:[%s1914_s11 + $0x250] sm:$0xff]  ;;  %v482_v10 = vld [vmem:[%s1914_s11 + $0x278] sm:$0xff] }
  0x9d   : > { %1223 = vmatpush1.bf16.msra.mxu0 %v1222_v45  ;;  %v464_v45 = vld [vmem:[%s1914_s11 + $0x1e8] sm:$0xff]  ;;  %1333 = vmatprep.subr.bf16.mxu1 %v1332_v37  ;;  %v471_v62 = vld [vmem:[%s1914_s11 + $0x220] sm:$0xff]  ;;  %v1272_v12 = vpack.c.bf16 %v482_v10, %v480_v9  ;;  %v481_v14 = vld [vmem:[%s1914_s11 + $0x270] sm:$0xff] }
  0x9e   : > { %1225 = vmatprep.subr.bf16.mxu0 %v1224_v46  ;;  %v466_v46 = vld [vmem:[%s1914_s11 + $0x1f8] sm:$0xff]  ;;  %v399_v4 = vld [vmem:[#allocation3 + $0x20] sm:$0xff]  ;;  %v485_v20 = vld [vmem:[%s1914_s11 + $0x290] sm:$0xff] }
  0x9f   : > { %v1256_v48 = vpack.c.bf16 %v466_v46, %v464_v45  ;;  %v479_v13 = vld [vmem:[%s1914_s11 + $0x260] sm:$0xff]  ;;  %v486_v16 = vld [vmem:[%s1914_s11 + $0x298] sm:$0xff]  ;;  %v488_v21 = vld [vmem:[%s1914_s11 + $0x2a8] sm:$0xff] }
  0xa0   : > { %1335 = vmatpush1.bf16.msra.mxu1 %v1334_v44  ;;  %v1274_v17 = vpack.c.bf16 %v481_v14, %v479_v13  ;;  %v483_v19 = vld [vmem:[%s1914_s11 + $0x280] sm:$0xff]  ;;  %v490_v22 = vld [vmem:[%s1914_s11 + $0x2b8] sm:$0xff]  ;;  %v489_v26 = vld [vmem:[%s1914_s11 + $0x2b0] sm:$0xff] }
  0xa1   : > { %1227 = vmatpush1.bf16.msra.mxu0 %v1226_v51  ;;  %v468_v51 = vld [vmem:[%s1914_s11 + $0x208] sm:$0xff]  ;;  %v1278_v23 = vpack.c.bf16 %v485_v20, %v483_v19  ;;  %v1280_v24 = vpack.c.bf16 %v490_v22, %v488_v21  ;;  %v487_v25 = vld [vmem:[%s1914_s11 + $0x2a0] sm:$0xff]  ;;  %v494_v28 = vld [vmem:[%s1914_s11 + $0x2d8] sm:$0xff] }
  0xa2   : > { %1229 = vmatprep.subr.bf16.mxu0 %v1228_v52  ;;  %v470_v52 = vld [vmem:[%s1914_s11 + $0x218] sm:$0xff]  ;;  %v1282_v29 = vpack.c.bf16 %v489_v26, %v487_v25  ;;  %v493_v32 = vld [vmem:[%s1914_s11 + $0x2d0] sm:$0xff]  ;;  %v496_v33 = vld [vmem:[%s1914_s11 + $0x2e8] sm:$0xff] }
  0xa3   : > { %v1260_v54 = vpack.c.bf16 %v470_v52, %v468_v51  ;;  %v498_v34 = vld [vmem:[%s1914_s11 + $0x2f8] sm:$0xff]  ;;  %v495_v37 = vld [vmem:[%s1914_s11 + $0x2e0] sm:$0xff]  ;;  %v497_v38 = vld [vmem:[%s1914_s11 + $0x2f0] sm:$0xff] }
  0xa4   : > { %v1288_v36 = vpack.c.bf16 %v498_v34, %v496_v33  ;;  %v500_v39 = vld [vmem:[%s1914_s11 + $0x308] sm:$0xff]  ;;  %v499_v43 = vld [vmem:[%s1914_s11 + $0x300] sm:$0xff]  ;;  %v501_v44 = vld [vmem:[%s1914_s11 + $0x310] sm:$0xff] }
  0xa5   : > { %1231 = vmatpush1.bf16.msra.mxu0 %v1230_v57  ;;  %v472_v57 = vld [vmem:[%s1914_s11 + $0x228] sm:$0xff]  ;;  %v506_v46 = vld [vmem:[%s1914_s11 + $0x338] sm:$0xff]  ;;  %v503_v49 = vld [vmem:[%s1914_s11 + $0x320] sm:$0xff] }
  0xa6   : > { %1233 = vmatprep.subr.bf16.mxu0 %v1232_v58  ;;  %v474_v58 = vld [vmem:[%s1914_s11 + $0x238] sm:$0xff]  ;;  %v504_v45 = vld [vmem:[%s1914_s11 + $0x328] sm:$0xff]  ;;  %v505_v50 = vld [vmem:[%s1914_s11 + $0x330] sm:$0xff] }
  0xa7   : > { %v1264_v61 = vpack.c.bf16 %v474_v58, %v472_v57  ;;  %v508_v51 = vld [vmem:[%s1914_s11 + $0x348] sm:$0xff]  ;;  %v510_v52 = vld [vmem:[%s1914_s11 + $0x358] sm:$0xff]  ;;  %v507_v55 = vld [vmem:[%s1914_s11 + $0x340] sm:$0xff] }
  0xa8   : > { %v509_v56 = vld [vmem:[%s1914_s11 + $0x350] sm:$0xff]  ;;  %v512_v57 = vld [vmem:[%s1914_s11 + $0x368] sm:$0xff]  ;;  %v514_v58 = vld [vmem:[%s1914_s11 + $0x378] sm:$0xff] }
  0xa9   : > { %1235 = vmatpush1.bf16.msra.mxu0 %v1234_v63  ;;  %v473_v63 = vld [vmem:[%s1914_s11 + $0x230] sm:$0xff]  ;;  %v519_v9 = vld [vmem:[%s1914_s11 + $0x3a0] sm:$0xff]  ;;  %v402_v25 = vld [vmem:[#allocation3 + $0x38] sm:$0xff] }
  0xaa   : > { %1237 = vmatprep.subr.bf16.mxu0 %v1236_v0  ;;  %v400_v0 = vld [vmem:[#allocation3 + $0x28] sm:$0xff]  ;;  %v1266_v3 = vpack.c.bf16 %v473_v63, %v471_v62  ;;  %v513_v62 = vld [vmem:[%s1914_s11 + $0x370] sm:$0xff]  ;;  %v527_v21 = vld [vmem:[%s1914_s11 + $0x3e0] sm:$0xff] }
  0xab   : > { %v516_v63 = vld [vmem:[%s1914_s11 + $0x388] sm:$0xff]  ;;  %v521_v10 = vld [vmem:[%s1914_s11 + $0x3b0] sm:$0xff]  ;;  %v828_v34 = vld [vmem:[%s1927_s18 + $0x98] sm:$0xff] }
  0xac   : > { %v1314_v13 = vpack.c.bf16 %v521_v10, %v519_v9  ;;  %v529_v22 = vld [vmem:[%s1914_s11 + $0x3f0] sm:$0xff]  ;;  %v826_v33 = vld [vmem:[%s1927_s18 + $0x88] sm:$0xff] }
  0xad   : > { %1239 = vmatpush1.bf16.msra.mxu0 %v1238_v5  ;;  %v1268_v5 = vpack.c.bf16 %v478_v2, %v476_v1  ;;  %v401_v26 = vld [vmem:[#allocation3 + $0x30] sm:$0xff]  ;;  %v854_v10 = vld [vmem:[%s1927_s18 + $0x168] sm:$0xff] }
  0xae   : > { %1241 = vmatprep.subr.bf16.mxu0 %v1240_v6  ;;  %v475_v6 = vld [vmem:[%s1914_s11 + $0x240] sm:$0xff]  ;;  %v851_v9 = vld [vmem:[%s1927_s18 + $0x150] sm:$0xff] }
  0xb1   : > { %1243 = vmatpush1.bf16.msra.mxu0 %v1242_v11  ;;  %v1270_v11 = vpack.c.bf16 %v477_v7, %v475_v6  ;;  %v522_v6 = vld [vmem:[%s1914_s11 + $0x3b8] sm:$0xff] }
  0xb2   : > { %1245 = vmatprep.subr.bf16.mxu0 %v1244_v15  ;;  %v484_v15 = vld [vmem:[%s1914_s11 + $0x288] sm:$0xff] }
  0xb3   : > { %v1276_v18 = vpack.c.bf16 %v486_v16, %v484_v15  ;;  %v523_v15 = vld [vmem:[%s1914_s11 + $0x3c0] sm:$0xff]  ;;  %v525_v16 = vld [vmem:[%s1914_s11 + $0x3d0] sm:$0xff] }
  0xb4   : > { %v1318_v19 = vpack.c.bf16 %v525_v16, %v523_v15  ;;  %v855_v15 = vld [vmem:[%s1927_s18 + $0x170] sm:$0xff]  ;;  %v858_v16 = vld [vmem:[%s1927_s18 + $0x188] sm:$0xff] }
  0xb5   : > { %1247 = vmatpush1.bf16.msra.mxu0 %v1246_v27  ;;  %v492_v27 = vld [vmem:[%s1914_s11 + $0x2c8] sm:$0xff] }
  0xb6   : > { %1249 = vmatprep.subr.bf16.mxu0 %v1248_v31  ;;  %v1284_v30 = vpack.c.bf16 %v494_v28, %v492_v27  ;;  %v491_v31 = vld [vmem:[%s1914_s11 + $0x2c0] sm:$0xff]  ;;  %v822_v27 = vld [vmem:[%s1927_s18 + $0x68] sm:$0xff]  ;;  %v824_v28 = vld [vmem:[%s1927_s18 + $0x78] sm:$0xff] }
  0xb7   : > { %v1286_v35 = vpack.c.bf16 %v493_v32, %v491_v31  ;;  %v823_v31 = vld [vmem:[%s1927_s18 + $0x70] sm:$0xff] }
  0xb9   : > { %1251 = vmatpush1.bf16.msra.mxu0 %v1250_v40  ;;  %v502_v40 = vld [vmem:[%s1914_s11 + $0x318] sm:$0xff] }
  0xba   : > { %1253 = vmatprep.subr.bf16.mxu0 %v1252_v41  ;;  %v1290_v41 = vpack.c.bf16 %v497_v38, %v495_v37  ;;  %v1292_v42 = vpack.c.bf16 %v502_v40, %v500_v39  ;;  %v827_v37 = vld [vmem:[%s1927_s18 + $0x90] sm:$0xff]  ;;  %v830_v39 = vld [vmem:[%s1927_s18 + $0xa8] sm:$0xff]  ;;  %v832_v40 = vld [vmem:[%s1927_s18 + $0xb8] sm:$0xff] }
  0xbd   : > { %1255 = vmatpush1.bf16.msra.mxu0 %v1254_v47  ;;  %v1294_v47 = vpack.c.bf16 %v501_v44, %v499_v43  ;;  %v831_v43 = vld [vmem:[%s1927_s18 + $0xb0] sm:$0xff] }
  0xbe   : > { %1257 = vmatprep.subr.bf16.mxu0 %v1256_v48  ;;  %v1296_v48 = vpack.c.bf16 %v506_v46, %v504_v45  ;;  %v834_v45 = vld [vmem:[%s1927_s18 + $0xc8] sm:$0xff]  ;;  %v836_v46 = vld [vmem:[%s1927_s18 + $0xd8] sm:$0xff] }
  0xc1   : > { %1259 = vmatpush1.bf16.msra.mxu0 %v1258_v53  ;;  %v1298_v53 = vpack.c.bf16 %v505_v50, %v503_v49  ;;  %v835_v49 = vld [vmem:[%s1927_s18 + $0xd0] sm:$0xff] }
  0xc2   : > { %1261 = vmatprep.subr.bf16.mxu0 %v1260_v54  ;;  %v1300_v54 = vpack.c.bf16 %v510_v52, %v508_v51  ;;  %v838_v51 = vld [vmem:[%s1927_s18 + $0xe8] sm:$0xff]  ;;  %v840_v52 = vld [vmem:[%s1927_s18 + $0xf8] sm:$0xff] }
  0xc4   : > { %608 = vmatmul.mubr.f32.vlgmr.msra.gmra.mrb[0].mxu0 %v395_v59  ;;  %v1302_v59 = vpack.c.bf16 %v509_v56, %v507_v55  ;;  %v839_v55 = vld [vmem:[%s1927_s18 + $0xf0] sm:$0xff] }
  0xc5   : > { %1263 = vmatpush1.bf16.msra.mxu0 %v1262_v60  ;;  %613 = vmatprep.mubr.f32.mxu0 %v400_v0  ;;  %v1304_v60 = vpack.c.bf16 %v514_v58, %v512_v57  ;;  %v518_v0 = vld [vmem:[%s1914_s11 + $0x398] sm:$0xff]  ;;  %v842_v57 = vld [vmem:[%s1927_s18 + $0x108] sm:$0xff] }
  0xc6   : > { %1265 = vmatprep.subr.bf16.mxu0 %v1264_v61  ;;  %v511_v61 = vld [vmem:[%s1914_s11 + $0x360] sm:$0xff]  ;;  %v1308_v2 = vpack.c.bf16 %v518_v0, %v516_v63  ;;  %v844_v58 = vld [vmem:[%s1927_s18 + $0x118] sm:$0xff] }
  0xc7   : > { %v1306_v1 = vpack.c.bf16 %v513_v62, %v511_v61  ;;  %v843_v61 = vld [vmem:[%s1927_s18 + $0x110] sm:$0xff]  ;;  %v846_v62 = vld [vmem:[%s1927_s18 + $0x128] sm:$0xff]  ;;  %v848_v0 = vld [vmem:[%s1927_s18 + $0x138] sm:$0xff] }
  0xc8   : > { %614 = vmatmul.mubr.f32.gmra.mrb[2].mxu0 %v399_v4  ;;  %v517_v4 = vld [vmem:[%s1914_s11 + $0x390] sm:$0xff] }
  0xc9   : > { %1267 = vmatpush1.bf16.msra.mxu0 %v1266_v3  ;;  %684 = vmatprep.mubr.f32.mxu0 %v398_v8  ;;  %v515_v3 = vld [vmem:[%s1914_s11 + $0x380] sm:$0xff] }
  0xca   : > { %1269 = vmatprep.subr.bf16.mxu0 %v1268_v5  ;;  %v520_v5 = vld [vmem:[%s1914_s11 + $0x3a8] sm:$0xff]  ;;  %v1310_v7 = vpack.c.bf16 %v517_v4, %v515_v3  ;;  %v1360_v3 = vpack.c.bf16 %v848_v0, %v846_v62 }
  0xcb   : > { %v1312_v8 = vpack.c.bf16 %v522_v6, %v520_v5  ;;  %v850_v4 = vld [vmem:[%s1927_s18 + $0x148] sm:$0xff]  ;;  %v852_v5 = vld [vmem:[%s1927_s18 + $0x158] sm:$0xff] }
  0xcd   : > { %1271 = vmatpush1.bf16.msra.mxu0 %v1270_v11  ;;  %v524_v11 = vld [vmem:[%s1914_s11 + $0x3c8] sm:$0xff] }
  0xce   : > { %1273 = vmatprep.subr.bf16.mxu0 %v1272_v12  ;;  %v526_v12 = vld [vmem:[%s1914_s11 + $0x3d8] sm:$0xff] }
  0xcf   : > { %v1316_v14 = vpack.c.bf16 %v526_v12, %v524_v11  ;;  %v856_v11 = vld [vmem:[%s1927_s18 + $0x178] sm:$0xff] }
  0xd1   : > { %1275 = vmatpush1.bf16.msra.mxu0 %v1274_v17  ;;  %v528_v17 = vld [vmem:[%s1914_s11 + $0x3e8] sm:$0xff] }
  0xd2   : > { %1277 = vmatprep.subr.bf16.mxu0 %v1276_v18  ;;  %v530_v18 = vld [vmem:[%s1914_s11 + $0x3f8] sm:$0xff] }
  0xd3   : > { %v1320_v20 = vpack.c.bf16 %v530_v18, %v528_v17  ;;  %v860_v17 = vld [vmem:[%s1927_s18 + $0x198] sm:$0xff] }
  0xd5   : > { %1279 = vmatpush1.bf16.msra.mxu0 %v1278_v23  ;;  %v1322_v23 = vpack.c.bf16 %v529_v22, %v527_v21  ;;  %v859_v21 = vld [vmem:[%s1927_s18 + $0x190] sm:$0xff]  ;;  %v862_v22 = vld [vmem:[%s1927_s18 + $0x1a8] sm:$0xff] }
  0xd6   : > { %1281 = vmatprep.subr.bf16.mxu0 %v1280_v24  ;;  %v397_v24 = vld [vmem:[#allocation3 + $0x10] sm:$0xff] }
  0xd9   : > { %1283 = vmatpush1.bf16.msra.mxu0 %v1282_v29  ;;  %v1336_v29 = vpack.c.bf16 %v824_v28, %v822_v27  ;;  %v863_v27 = vld [vmem:[%s1927_s18 + $0x1b0] sm:$0xff]  ;;  %v866_v28 = vld [vmem:[%s1927_s18 + $0x1c8] sm:$0xff] }
  0xda   : > { %1285 = vmatprep.subr.bf16.mxu0 %v1284_v30  ;;  %v821_v30 = vld [vmem:[%s1927_s18 + $0x60] sm:$0xff] }
  0xdb   : > { %v1338_v32 = vpack.c.bf16 %v823_v31, %v821_v30  ;;  %1337 = vmatprep.subr.bf16.mxu1 %v1336_v29  ;;  %v868_v29 = vld [vmem:[%s1927_s18 + $0x1d8] sm:$0xff] }
  0xdc   : > { %v1380_v31 = vpack.c.bf16 %v868_v29, %v866_v28 }
  0xdd   : > { %1287 = vmatpush1.bf16.msra.mxu0 %v1286_v35  ;;  %1339 = vmatpush1.bf16.msra.mxu1 %v1338_v32  ;;  %v1340_v35 = vpack.c.bf16 %v828_v34, %v826_v33  ;;  %v865_v32 = vld [vmem:[%s1927_s18 + $0x1c0] sm:$0xff]  ;;  %v867_v33 = vld [vmem:[%s1927_s18 + $0x1d0] sm:$0xff]  ;;  %v870_v34 = vld [vmem:[%s1927_s18 + $0x1e8] sm:$0xff] }
  0xde   : > { %1289 = vmatprep.subr.bf16.mxu0 %v1288_v36  ;;  %v825_v36 = vld [vmem:[%s1927_s18 + $0x80] sm:$0xff] }
  0xdf   : > { %1341 = vmatprep.subr.bf16.mxu1 %v1340_v35  ;;  %v1342_v38 = vpack.c.bf16 %v827_v37, %v825_v36  ;;  %v872_v35 = vld [vmem:[%s1927_s18 + $0x1f8] sm:$0xff]  ;;  %v1382_v36 = vpack.c.bf16 %v867_v33, %v865_v32 }
  0xe0   : > { %v1384_v37 = vpack.c.bf16 %v872_v35, %v870_v34 }
  0xe1   : > { %1291 = vmatpush1.bf16.msra.mxu0 %v1290_v41  ;;  %1343 = vmatpush1.bf16.msra.mxu1 %v1342_v38  ;;  %v1344_v41 = vpack.c.bf16 %v832_v40, %v830_v39  ;;  %v869_v38 = vld [vmem:[%s1927_s18 + $0x1e0] sm:$0xff]  ;;  %v871_v39 = vld [vmem:[%s1927_s18 + $0x1f0] sm:$0xff] }
  0xe2   : > { %1293 = vmatprep.subr.bf16.mxu0 %v1292_v42  ;;  %v829_v42 = vld [vmem:[%s1927_s18 + $0xa0] sm:$0xff]  ;;  %v1386_v40 = vpack.c.bf16 %v871_v39, %v869_v38 }
  0xe3   : > { %v1346_v44 = vpack.c.bf16 %v831_v43, %v829_v42  ;;  %1345 = vmatprep.subr.bf16.mxu1 %v1344_v41  ;;  %v533_v41 = vlaneseq }
  0xe5   : > { %1295 = vmatpush1.bf16.msra.mxu0 %v1294_v47  ;;  %1347 = vmatpush1.bf16.msra.mxu1 %v1346_v44  ;;  %v1348_v47 = vpack.c.bf16 %v836_v46, %v834_v45  ;;  %v534_v42 = vshrl.u32 %v533_v41, 7  ;;  %v531_v44 = vld [vmem:[%s383_s16] sm:$0x3] }
  0xe6   : > { %1297 = vmatprep.subr.bf16.mxu0 %v1296_v48  ;;  %v833_v48 = vld [vmem:[%s1927_s18 + $0xc0] sm:$0xff] }
  0xe7   : > { %v1350_v50 = vpack.c.bf16 %v835_v49, %v833_v48  ;;  %1349 = vmatprep.subr.bf16.mxu1 %v1348_v47  ;;  %v2122_v43 = vsub.s32 0, %v534_v42  ;;  %v2129_v45 = vsub.s32 1, %v534_v42 }
  0xe9   : > { %1299 = vmatpush1.bf16.msra.mxu0 %v1298_v53  ;;  %1351 = vmatpush1.bf16.msra.mxu1 %v1350_v50  ;;  %v1352_v53 = vpack.c.bf16 %v840_v52, %v838_v51  ;;  %v536_v46 = vrot.slane %v531_v44, %v2122_v43  ;;  %v540_v47 = vrot.slane %v531_v44, %v2129_v45 }
  0xea   : > { %1301 = vmatprep.subr.bf16.mxu0 %v1300_v54  ;;  %v837_v54 = vld [vmem:[%s1927_s18 + $0xe0] sm:$0xff] }
  0xeb   : > { %v1354_v56 = vpack.c.bf16 %v839_v55, %v837_v54  ;;  %1353 = vmatprep.subr.bf16.mxu1 %v1352_v53 }
  0xed   : > { %1303 = vmatpush1.bf16.msra.mxu0 %v1302_v59  ;;  %1355 = vmatpush1.bf16.msra.mxu1 %v1354_v56  ;;  %v1356_v59 = vpack.c.bf16 %v844_v58, %v842_v57 }
  0xee   : > { %1305 = vmatprep.subr.bf16.mxu0 %v1304_v60  ;;  %v841_v60 = vld [vmem:[%s1927_s18 + $0x100] sm:$0xff] }
  0xef   : > { %v1358_v63 = vpack.c.bf16 %v843_v61, %v841_v60  ;;  %1357 = vmatprep.subr.bf16.mxu1 %v1356_v59 }
  0xf1   : > { %1307 = vmatpush1.bf16.msra.mxu0 %v1306_v1  ;;  %v845_v1 = vld [vmem:[%s1927_s18 + $0x120] sm:$0xff]  ;;  %1359 = vmatpush1.bf16.msra.mxu1 %v1358_v63 }
  0xf2   : > { %1309 = vmatprep.subr.bf16.mxu0 %v1308_v2  ;;  %v847_v2 = vld [vmem:[%s1927_s18 + $0x130] sm:$0xff]  ;;  %1361 = vmatprep.subr.bf16.mxu1 %v1360_v3 }
  0xf3   : > { %v1362_v6 = vpack.c.bf16 %v847_v2, %v845_v1 }
  0xf5   : > { %1311 = vmatpush1.bf16.msra.mxu0 %v1310_v7  ;;  %v1364_v7 = vpack.c.bf16 %v852_v5, %v850_v4  ;;  %1363 = vmatpush1.bf16.msra.mxu1 %v1362_v6 }
  0xf6   : > { %1313 = vmatprep.subr.bf16.mxu0 %v1312_v8  ;;  %v849_v8 = vld [vmem:[%s1927_s18 + $0x140] sm:$0xff] }
  0xf7   : > { %v1366_v12 = vpack.c.bf16 %v851_v9, %v849_v8  ;;  %1365 = vmatprep.subr.bf16.mxu1 %v1364_v7 }
  0xf9   : > { %1315 = vmatpush1.bf16.msra.mxu0 %v1314_v13  ;;  %v1368_v13 = vpack.c.bf16 %v856_v11, %v854_v10  ;;  %1367 = vmatpush1.bf16.msra.mxu1 %v1366_v12 }
  0xfa   : > { %1317 = vmatprep.subr.bf16.mxu0 %v1316_v14  ;;  %v853_v14 = vld [vmem:[%s1927_s18 + $0x160] sm:$0xff] }
  0xfb   : > { %v1370_v18 = vpack.c.bf16 %v855_v15, %v853_v14  ;;  %1369 = vmatprep.subr.bf16.mxu1 %v1368_v13 }
  0xfd   : > { %1319 = vmatpush1.bf16.msra.mxu0 %v1318_v19  ;;  %v1372_v19 = vpack.c.bf16 %v860_v17, %v858_v16  ;;  %1371 = vmatpush1.bf16.msra.mxu1 %v1370_v18 }
  0xfe   : > { %1321 = vmatprep.subr.bf16.mxu0 %v1320_v20  ;;  %v857_v20 = vld [vmem:[%s1927_s18 + $0x180] sm:$0xff] }
  0xff   : > { %1373 = vmatprep.subr.bf16.mxu1 %v1372_v19 }
 0x101   : > { %1323 = vmatpush1.bf16.msra.mxu0 %v1322_v23  ;;  %v864_v23 = vld [vmem:[%s1927_s18 + $0x1b8] sm:$0xff] }
 0x104   : > { %685 = vmatmul.mubr.f32.vlgmr.msra.gmra.mrb[0].mxu0 %v397_v24  ;;  %v1374_v24 = vpack.c.bf16 %v859_v21, %v857_v20 }
 0x105   : > { %690 = vmatprep.mubr.f32.mxu0 %v402_v25  ;;  %v1376_v25 = vpack.c.bf16 %v864_v23, %v862_v22 }
 0x106   : > { %1375 = vmatpush1.bf16.msra.mxu1 %v1374_v24 }
 0x107   : > { %1377 = vmatprep.subr.bf16.mxu1 %v1376_v25 }
 0x108   : > { %691 = vmatmul.mubr.f32.gmra.mrb[2].mxu0 %v401_v26  ;;  %v861_v26 = vld [vmem:[%s1927_s18 + $0x1a0] sm:$0xff] }
 0x109   : > { %v1378_v30 = vpack.c.bf16 %v863_v27, %v861_v26 }
 0x10b   : > { %1379 = vmatpush1.bf16.msra.mxu1 %v1378_v30 }
 0x10c   : > { %1381 = vmatprep.subr.bf16.mxu1 %v1380_v31 }
 0x10f   : > { %1383 = vmatpush1.bf16.msra.mxu1 %v1382_v36 }
 0x110   : > { %1385 = vmatprep.subr.bf16.mxu1 %v1384_v37 }
 0x113   : > { %1387 = vmatpush1.bf16.msra.mxu1 %v1386_v40 }
 0x1d7   : > { %v686_v48 = vpop.f32.mrb[0].mxu0 }
 0x1d8   : > { %v2133_v49 = vadd.f32 %v686_v48, %v536_v46  ;;  %v688_v50 = vpop.f32.mrb[1].mxu0 }
 0x1d9   : > { %v2135_v51 = vadd.f32 %v688_v50, %v540_v47 }
 0x1da   : > { %v2138_v52 = vmul.f32 0.70710677, %v2133_v49 }
 0x1db   : > { %v2141_v53 = vmul.f32 0.70710677, %v2135_v51  ;;  %v692_v54 = vpop.f32.mrb[2].mxu0 }
 0x1dc   : > { %v713_v55 = vand.u32 2147483647, %v2138_v52  ;;  %v2144_v56 = vadd.f32 %v692_v54, %v536_v46  ;;  %v694_v57 = vpop.f32.mrb[3].mxu0  ;;  %vm705_vm0 = vcmp.ge.f32.partialorder %v2138_v52, 0.0 }
 0x1dd   : > { %v714_v58 = vand.u32 2147483647, %v2141_v53  ;;  %v2147_v59 = vadd.f32 %v694_v57, %v540_v47  ;;  %vm706_vm1 = vcmp.ge.f32.partialorder %v2141_v53, 0.0 }
 0x1de   : > { %v717_v60 = vmul.f32 0.3275911, %v713_v55  ;;  %v2150_v61 = vmul.f32 0.70710677, %v2144_v56  ;;  %v769_v8 = vsub.f32 0.0, %v713_v55 }
 0x1df   : > { %v718_v62 = vmul.f32 0.3275911, %v714_v58  ;;  %v2153_v63 = vmul.f32 0.70710677, %v2147_v59  ;;  %v770_v9 = vsub.f32 0.0, %v714_v58 }
 0x1e0   : > { %v721_v0 = vadd.f32 1.0, %v717_v60  ;;  %v715_v1 = vand.u32 2147483647, %v2150_v61  ;;  %v773_v11 = vmul.f32 %v769_v8, %v713_v55  ;;  %vm707_vm2 = vcmp.ge.f32.partialorder %v2150_v61, 0.0 }
 0x1e1   : > { %v722_v2 = vadd.f32 1.0, %v718_v62  ;;  %v716_v4 = vand.u32 2147483647, %v2153_v63  ;;  %v774_v14 = vmul.f32 %v770_v9, %v714_v58  ;;  %vm708_vm3 = vcmp.ge.f32.partialorder %v2153_v63, 0.0 }
 0x1e2   : > { %1482 = vrcp.f32 %v721_v0  ;;  %v719_v3 = vmul.f32 0.3275911, %v715_v1  ;;  %v771_v12 = vsub.f32 0.0, %v715_v1  ;;  %v777_v20 = vmul.f32 1.442695, %v773_v11 }
 0x1e3   : > { %1484 = vrcp.f32 %v722_v2  ;;  %v720_v6 = vmul.f32 0.3275911, %v716_v4  ;;  %v772_v17 = vsub.f32 0.0, %v716_v4  ;;  %v779_v23 = vmul.f32 1.442695, %v774_v14 }
 0x1e4   : > { %v723_v5 = vadd.f32 1.0, %v719_v3  ;;  %v775_v21 = vmul.f32 %v771_v12, %v715_v1  ;;  %v1684_v11 = vmov -1.0  }
 0x1e5   : > { %v724_v7 = vadd.f32 1.0, %v720_v6  ;;  %v776_v28 = vmul.f32 %v772_v17, %v716_v4  ;;  %v709_v12 = vsel %vm705_vm0, 1.0, %v1684_v11 }
 0x1e6   : > { %1486 = vrcp.f32 %v723_v5  ;;  %v781_v31 = vmul.f32 1.442695, %v775_v21 }
 0x1e7   : > { %1488 = vrcp.f32 %v724_v7  ;;  %v783_v38 = vmul.f32 1.442695, %v776_v28  ;;  %v712_v28 = vsel %vm708_vm3, 1.0, %v1684_v11 }
 0x1e8   : > { %1490 = vpow2.f32 %v777_v20  ;;  %v698_v20 = vmul.f32 0.5, %v2135_v51  ;;  %v700_v51 = vmul.f32 0.5, %v2147_v59 }
 0x1e9   : > { %1492 = vpow2.f32 %v779_v23 }
 0x1ea   : > { %1494 = vpow2.f32 %v781_v31 }
 0x1eb   : > { %1496 = vpow2.f32 %v783_v38 }
 0x1ec   : > { %v1483_v10 = vpop.eup %1482 }
 0x1ed   : > { %v1485_v13 = vpop.eup %1484  ;;  %v733_v15 = vmul.f32 1.0614054, %v1483_v10 }
 0x1ee   : > { %v734_v16 = vmul.f32 1.0614054, %v1485_v13 }
 0x1ef   : > { %v737_v18 = vadd.f32 -1.4531521, %v733_v15 }
 0x1f0   : > { %v1487_v19 = vpop.eup %1486  ;;  %v738_v22 = vadd.f32 -1.4531521, %v734_v16 }
 0x1f1   : > { %v741_v24 = vmul.f32 %v1483_v10, %v737_v18  ;;  %v735_v25 = vmul.f32 1.0614054, %v1487_v19  ;;  %v1489_v27 = vpop.eup %1488 }
 0x1f2   : > { %v742_v26 = vmul.f32 %v1485_v13, %v738_v22  ;;  %v736_v33 = vmul.f32 1.0614054, %v1489_v27  ;;  %v1491_v62 = vpop.eup %1490  ;;  %v711_v22 = vsel %vm707_vm2, 1.0, %v1684_v11 }
 0x1f3   : > { %v745_v29 = vadd.f32 1.4214138, %v741_v24  ;;  %v739_v30 = vadd.f32 -1.4531521, %v735_v25  ;;  %v1493_v2 = vpop.eup %1492  ;;  %v697_v24 = vmul.f32 0.5, %v2133_v49  ;;  %v806_v49 = vld [vmem:[#allocation2 + $0x8] sm:$0xff] }
 0x1f4   : > { %v746_v32 = vadd.f32 1.4214138, %v742_v26  ;;  %v740_v37 = vadd.f32 -1.4531521, %v736_v33  ;;  %v1495_v9 = vpop.eup %1494 }
 0x1f5   : > { %v749_v34 = vmul.f32 %v1483_v10, %v745_v29  ;;  %v743_v35 = vmul.f32 %v1487_v19, %v739_v30  ;;  %v1497_v18 = vpop.eup %1496 }
 0x1f6   : > { %v750_v36 = vmul.f32 %v1485_v13, %v746_v32  ;;  %v744_v42 = vmul.f32 %v1489_v27, %v740_v37  ;;  %v699_v32 = vmul.f32 0.5, %v2144_v56 }
 0x1f7   : > { %v753_v39 = vadd.f32 -0.28449672, %v749_v34  ;;  %v747_v40 = vadd.f32 1.4214138, %v743_v35  ;;  %v805_v34 = vld [vmem:[#allocation2] sm:$0xff] }
 0x1f8   : > { %v754_v41 = vadd.f32 -0.28449672, %v750_v36  ;;  %v748_v48 = vadd.f32 1.4214138, %v744_v42 }
 0x1f9   : > { %v757_v44 = vmul.f32 %v1483_v10, %v753_v39  ;;  %v751_v46 = vmul.f32 %v1487_v19, %v747_v40  ;;  %v807_v39 = vld [vmem:[#allocation2 + $0x10] sm:$0xff]  ;;  %v808_v40 = vld [vmem:[#allocation2 + $0x18] sm:$0xff] }
 0x1fa   : > { %v758_v47 = vmul.f32 %v1485_v13, %v754_v41  ;;  %v752_v57 = vmul.f32 %v1489_v27, %v748_v48 }
 0x1fb   : > { %v761_v50 = vadd.f32 0.2548296, %v757_v44  ;;  %v755_v54 = vadd.f32 -0.28449672, %v751_v46 }
 0x1fc   : > { %v762_v55 = vadd.f32 0.2548296, %v758_v47  ;;  %v756_v1 = vadd.f32 -0.28449672, %v752_v57  ;;  %v966_v47 = vld [vmem:[%s2226_s4] sm:$0x3] (!%p1188_p5) }
 0x1fd   : > { %v765_v58 = vmul.f32 %v1483_v10, %v761_v50  ;;  %v759_v60 = vmul.f32 %v1487_v19, %v755_v54  ;;  %v971_v48 = vrot.slane (!%p1188_p5), %v966_v47, %v2122_v43  ;;  %v975_v50 = vrot.slane (!%p1188_p5), %v966_v47, %v2129_v45 }
 0x1fe   : > { %v766_v0 = vmul.f32 %v1485_v13, %v762_v55  ;;  %v760_v6 = vmul.f32 %v1489_v27, %v756_v1  ;;  %v710_v13 = vsel %vm706_vm1, 1.0, %v1684_v11 }
 0x1ff   : > { %v785_v3 = vmul.f32 %v1491_v62, %v765_v58  ;;  %v763_v4 = vadd.f32 0.2548296, %v759_v60 }
 0x200   : > { %v786_v5 = vmul.f32 %v1493_v2, %v766_v0  ;;  %v764_v10 = vadd.f32 0.2548296, %v760_v6 }
 0x201   : > { %v789_v7 = vsub.f32 1.0, %v785_v3  ;;  %v767_v8 = vmul.f32 %v1487_v19, %v763_v4 }
 0x202   : > { %v790_v14 = vsub.f32 1.0, %v786_v5  ;;  %v768_v52 = vmul.f32 %v1489_v27, %v764_v10 }
 0x203   : > { %v793_v15 = vmul.f32 %v789_v7, %v709_v12  ;;  %v787_v16 = vmul.f32 %v1495_v9, %v767_v8 }
 0x204   : > { %v794_v17 = vmul.f32 %v790_v14, %v710_v13  ;;  %v788_v23 = vmul.f32 %v1497_v18, %v768_v52 }
 0x205   : > { %v797_v53 = vadd.f32 1.0, %v793_v15  ;;  %v791_v21 = vsub.f32 1.0, %v787_v16 }
 0x206   : > { %v798_v19 = vadd.f32 1.0, %v794_v17  ;;  %v792_v61 = vsub.f32 1.0, %v788_v23 }
 0x207   : > { %v795_v25 = vmul.f32 %v791_v21, %v711_v22  ;;  %v801_v29 = vmul.f32 %v797_v53, %v697_v24  ;;  %v1018_v21 = vld [vmem:[%s2227_s5] sm:$0x3] (!%p1188_p5) }
 0x208   : > { %v802_v26 = vmul.f32 %v798_v19, %v698_v20  ;;  %v796_v30 = vmul.f32 %v792_v61, %v712_v28  ;;  %v1034_v22 = vld [vmem:[%s2228_s6] sm:$0x3] (!%p1188_p5)  ;;  %v1023_v24 = vrot.slane (!%p1188_p5), %v1018_v21, %v2122_v43 }
 0x209   : > { %v799_v27 = vadd.f32 1.0, %v795_v25  ;;  %v1027_v25 = vrot.slane (!%p1188_p5), %v1018_v21, %v2129_v45  ;;  %v1039_v61 = vrot.slane (!%p1188_p5), %v1034_v22, %v2122_v43  ;;  %v1043_v28 = vrot.slane (!%p1188_p5), %v1034_v22, %v2129_v45 }
 0x20a   : > { %937 = vmatprep.mubr.f32.mxu1 %v802_v26  ;;  %v800_v31 = vadd.f32 1.0, %v796_v30 }
 0x20b   : > { %938 = vmatmul.mubr.f32.vlgmr.msra.gmra.mrb[0].mxu1 %v801_v29  ;;  %v803_v63 = vmul.f32 %v799_v27, %v699_v32 }
 0x20c   : > { %v804_v33 = vmul.f32 %v800_v31, %v700_v51 }
 0x20e   : > { %943 = vmatprep.mubr.f32.mxu1 %v804_v33 }
 0x20f   : > { %944 = vmatmul.mubr.f32.gmra.mrb[2].mxu1 %v803_v63 }
 0x2de   : > { %v939_v35 = vpop.f32.mrb[0].mxu1 }
 0x2df   : > { %v950_v36 = vadd.f32 %v939_v35, %v805_v34  ;;  %v941_v37 = vpop.f32.mrb[1].mxu1 }
 0x2e0   : > { %v951_v38 = vadd.f32 %v941_v37, %v806_v49  ;;  %961 = sbr.rel (%p1188_p5) target bundleno = 922 (0x39a), region = 68 }
 0x2e1   : > { %954 = vst [vmem:[#allocation2] sm:$0xff] %v950_v36 }
 0x2e2   : > { %955 = vst [vmem:[#allocation2 + $0x8] sm:$0xff] %v951_v38  ;;  %v945_v41 = vpop.f32.mrb[2].mxu1 }
 0x2e3   : > { %v952_v42 = vadd.f32 %v945_v41, %v807_v39  ;;  %v947_v59 = vpop.f32.mrb[3].mxu1 }
 0x2e4   : > { %v953_v44 = vadd.f32 %v947_v59, %v808_v40 }
 0x2e5   : > { %956 = vst [vmem:[#allocation2 + $0x10] sm:$0xff] %v952_v42 }
 0x2e6   : > { %957 = vst [vmem:[#allocation2 + $0x18] sm:$0xff] %v953_v44 }
 0x2e8   : > { %v962_v56 = vld [vmem:[#allocation2] sm:$0xff] }
 0x2e9   : > { %v963_v46 = vld [vmem:[#allocation2 + $0x8] sm:$0xff]  ;;  %v978_v57 = vadd.f32 %v971_v48, %v962_v56 }
 0x2ea   : > { %v979_v58 = vadd.f32 %v975_v50, %v963_v46 }
 0x2eb   : > { %v988_v1 = vmul.f32 %v978_v57, %v978_v57 }
 0x2ec   : > { %v964_v54 = vld [vmem:[#allocation2 + $0x10] sm:$0xff]  ;;  %v982_v0 = vadd.f32 %v979_v58, %v978_v57  ;;  %v989_v2 = vmul.f32 %v979_v58, %v979_v58 }
 0x2ed   : > { %v965_v55 = vld [vmem:[#allocation2 + $0x18] sm:$0xff]  ;;  %v980_v60 = vadd.f32 %v971_v48, %v964_v54 }
 0x2ee   : > { %v981_v62 = vadd.f32 %v975_v50, %v965_v55  ;;  %983 = vadd.xlane.f32.xlu0 %v982_v0  ;;  %v992_v5 = vadd.f32 %v989_v2, %v988_v1 }
 0x2ef   : > { %v990_v3 = vmul.f32 %v980_v60, %v980_v60 }
 0x2f0   : > { %v991_v4 = vmul.f32 %v981_v62, %v981_v62  ;;  %v985_v6 = vadd.f32 %v981_v62, %v980_v60  ;;  %993 = vadd.xlane.f32.xlu1 %v992_v5 }
 0x2f2   : > { %v995_v7 = vadd.f32 %v991_v4, %v990_v3  ;;  %986 = vadd.xlane.f32.xlu0 %v985_v6 }
 0x2f4   : > { %996 = vadd.xlane.f32.xlu1 %v995_v7 }
 0x37b   : > { %v984_v8 = vpop.xlane.xlu0 %983 }
 0x37c   : > { %v998_v9 = vmul.f32 0.00390625, %v984_v8 }
 0x37d   : > { %v994_v11 = vpop.xlane.xlu1 %993 }
 0x37e   : > { %v1000_v12 = vmul.f32 0.00390625, %v994_v11  ;;  %v1002_v14 = vmul.f32 %v998_v9, %v998_v9  ;;  %v1010_v19 = vsub.f32 %v978_v57, %v998_v9  ;;  %v1011_v23 = vsub.f32 %v979_v58, %v998_v9 }
 0x37f   : > { %v987_v10 = vpop.xlane.xlu0 %986 }
 0x380   : > { %v1004_v13 = vsub.f32 %v1000_v12, %v1002_v14  ;;  %v999_v15 = vmul.f32 0.00390625, %v987_v10 }
 0x381   : > { %v997_v16 = vpop.xlane.xlu1 %996 }
 0x382   : > { %v1006_v17 = vadd.f32 1e-05, %v1004_v13  ;;  %v1001_v52 = vmul.f32 0.00390625, %v997_v16  ;;  %v1003_v18 = vmul.f32 %v999_v15, %v999_v15  ;;  %v1012_v31 = vsub.f32 %v980_v60, %v999_v15 }
 0x383   : > { %v1013_v32 = vsub.f32 %v981_v62, %v999_v15 }
 0x384   : > { %1498 = vrsqrt.f32 %v1006_v17  ;;  %v1005_v20 = vsub.f32 %v1001_v52, %v1003_v18 }
 0x386   : > { %v1007_v53 = vadd.f32 1e-05, %v1005_v20 }
 0x388   : > { %1500 = vrsqrt.f32 %v1007_v53 }
 0x38e   : > { %v1499_v26 = vpop.eup %1498 }
 0x38f   : > { %v1014_v29 = vmul.f32 %v1499_v26, %v1010_v19  ;;  %v1015_v30 = vmul.f32 %v1499_v26, %v1011_v23 }
 0x391   : > { %v1030_v27 = vmul.f32 %v1023_v24, %v1014_v29  ;;  %v1031_v51 = vmul.f32 %v1027_v25, %v1015_v30 }
 0x392   : > { %v1501_v33 = vpop.eup %1500 }
 0x393   : > { %v1046_v63 = vadd.f32 %v1039_v61, %v1030_v27  ;;  %v1047_v34 = vadd.f32 %v1043_v28, %v1031_v51  ;;  %v1016_v49 = vmul.f32 %v1501_v33, %v1012_v31  ;;  %v1017_v35 = vmul.f32 %v1501_v33, %v1013_v32 }
 0x395   : > { %1050 = vst [vmem:[#allocation9] sm:$0xff] %v1046_v63  ;;  %1051 = vst [vmem:[#allocation9 + $0x8] sm:$0xff] %v1047_v34  ;;  %v1032_v36 = vmul.f32 %v1023_v24, %v1016_v49  ;;  %v1033_v37 = vmul.f32 %v1027_v25, %v1017_v35 }
 0x397   : > { %v1048_v38 = vadd.f32 %v1039_v61, %v1032_v36  ;;  %v1049_v39 = vadd.f32 %v1043_v28, %v1033_v37 }
 0x399   : > { %1052 = vst [vmem:[#allocation9 + $0x10] sm:$0xff] %v1048_v38  ;;  %1053 = vst [vmem:[#allocation9 + $0x18] sm:$0xff] %v1049_v39 }
 0x39a PF: > { %p1422_p1 = scmp.eq.s32.totalorder %s1819_s9, 1  ;;  %s1685_s20 = smov [#allocation9]  }
 0x39b   : > { %s1064_s24 = sshll.u32 %s1685_s20, 4  ;;  %s1065_s24 = int_to_ptr.vmem [resolvable:$true] %s1064_s24 }
 0x39c   : > { %s1590_s10 = scalar_lea.vmem %s1065_s24, 512  ;;  %p1597_p6 = scmp.lt.s32.totalorder %s1065_s24, %s1065_s24 }
 0x39d   : > { %p1591_p4 = scmp.ne.s32.totalorder %s1065_s24, %s1590_s10  ;;  %p1598_p3 = scmp.lt.s32.totalorder %s1590_s10, %s1590_s10 }
 0x39f   : > { %p1592_p7 = pnand %p1591_p4, %p1422_p1  ;;  %p1599_p9 = por %p1598_p3, %p1597_p6 }
 0x3a1   : > { %p1593_p13 = pneg %p1592_p7 }
 0x3a3   : > { %p1600_p2 = pnand %p1599_p9, %p1593_p13 }
 0x3a5   : > { %1603 = shalt.err (!%p1600_p2)
}
 0x3a6   : > { %s1604_s21 = scalar_lea.hbm %s2229_s7, 512 }
 0x3a7   : > { %p1605_p11 = scmp.ne.s32.totalorder %s2229_s7, %s1604_s21  ;;  %p1610_p8 = scmp.lt.u32.totalorder %s1604_s21, %s2229_s7 }
 0x3a9   : > { %p1606_p12 = pnand %p1605_p11, %p1422_p1 }
 0x3ab   : > { %p1607_p10 = pneg %p1606_p12 }
 0x3ad   : > { %p1612_p0 = pnand %p1610_p8, %p1607_p10 }
 0x3af   : > { %1615 = shalt.err (!%p1612_p0)
}
 0x3b0   : > { %s1686_s18 = smov 256   ;;  %s1687_s13 = smov 16  }
 0x3b1   : > { %1405 = dma.vmem_to_hbm [thread:$0]  (%p1422_p1), %s1065_s24, 512, %s2229_s7, [#allocation5], %s1686_s18, %s1686_s18, %s1687_s13  }
 0x3b2   : > { %1649 = dma.done.wait (%p1422_p1), [#allocation5], 512  }
 0x3b3   : > { %1651 = vsyncadd (%p1422_p1), [#allocation5], 4294966784 }
 0x3b4 PF: > { %s22_s29 = sadd.s32 1, %s1674_s29   ;;  %s2259_s27 = sld [smem:[#allocation13_spill]] }
 0x3b5   : > { %p19_p5 = scmp.ge.s32.totalorder %s22_s29, 4   ;;  %s2260_s28 = sld [smem:[#allocation14_spill]] }
 0x3b6   : > { %s2261_s24 = smov %s1658_s25  ;;  %s2262_s25 = smov %s1662_s26 }
 0x3b7   : > { %s2263_s26 = smov %s1771_s12  ;;  %21 = sbr.rel (!%p19_p5) target bundleno = 8 (0x8), region = 114 }
 0x3be   :  { %1080 = vsyncpa [#allocation4], 1 }
 0x3bf   :  { %1082 = vsyncpa [#allocation4 + $0x1], 1 }
 0x3c0   :  { %1083 = vsyncpa [#allocation7], 1 }
 0x3c1   :  { %1085 = vsyncpa [#allocation7 + $0x1], 1 }
 0x3c2   :  { %1086 = vsyncpa [#allocation5], 1 }
 0x3c3   :  { %1088 = vsyncpa [#allocation5 + $0x1], 1 }

</bundles_post_ra>
